<compile_context>
chip_gen: v5e
topology: v5e:2x2
jax: 0.10.0
libtpu: 0.0.40
codegen_flags: <defaults>
</compile_context>

<pallas_src>
import math
from functools import partial

import jax
import jax.numpy as jnp
from jax.experimental import pallas as pl
from jax.experimental.pallas import tpu as pltpu


# ----------------------------------------------------------------------------
# Pallas matmul kernels (bf16 MXU operands, f32 accumulate, fused epilogue)
# ----------------------------------------------------------------------------

_VMEM_LIMIT = 32 * 1024 * 1024          # safe on v5e/v6e (128 MiB) and v7x (64 MiB)
_TRANSC = ('sigmoid',)


def _round_up(v, m):
    return ((v + m - 1) // m) * m


def _row_tile(m):
    if m >= 1024:
        return 1024
    if m >= 512:
        return 512
    return _round_up(m, 8)


def _lane_tile(l):
    if l >= 1024:
        return 1024
    if l >= 512:
        return 512
    return _round_up(l, 128)


def _apply_act(y, act):
    if act == 'none':
        return y
    if act == 'sigmoid':
        return jax.nn.sigmoid(y)
    if act == 'relu':
        return jax.nn.relu(y)
    raise ValueError(act)


def _xw_kernel(x_ref, w_ref, b_ref, o_ref, *, act):
    acc = jnp.dot(x_ref[...], w_ref[...], preferred_element_type=jnp.float32)
    o_ref[...] = _apply_act(acc + b_ref[...], act)


def _wx_kernel(w_ref, x_ref, b_ref, o_ref, *, act):
    acc = jnp.dot(w_ref[...], x_ref[...], preferred_element_type=jnp.float32)
    o_ref[...] = _apply_act(acc + b_ref[...], act)


def matmul_xw(x, w_p, b_p, n_out, act='none'):
    """act(x @ W + b) with W pre-padded (Kp, Np) bf16 and b (1, Np) f32.

    x: (M, K) f32.  Returns (M, n_out) f32.
    """
    M, K = x.shape
    Kp, Np = w_p.shape
    TM = _row_tile(M)
    Mp = _round_up(M, TM)
    xp = jnp.pad(x, ((0, Mp - M), (0, Kp - K))).astype(jnp.bfloat16)
    out = pl.pallas_call(
        partial(_xw_kernel, act=act),
        out_shape=jax.ShapeDtypeStruct((Mp, Np), jnp.float32),
        grid=(Mp // TM,),
        in_specs=[
            pl.BlockSpec((TM, Kp), lambda i: (i, 0)),
            pl.BlockSpec((Kp, Np), lambda i: (0, 0)),
            pl.BlockSpec((1, Np), lambda i: (0, 0)),
        ],
        out_specs=pl.BlockSpec((TM, Np), lambda i: (i, 0)),
        compiler_params=pltpu.CompilerParams(
            dimension_semantics=("parallel",),
            vmem_limit_bytes=_VMEM_LIMIT),
        cost_estimate=pl.CostEstimate(
            flops=2 * Mp * Kp * Np,
            transcendentals=Mp * Np if act in _TRANSC else 0,
            bytes_accessed=Mp * Kp * 2 + Kp * Np * 2 + Mp * Np * 4),
    )(xp, w_p, b_p)
    return out[:M, :n_out]


def matmul_wx(x_bkl, w_p, b_p, act='none'):
    """out[b] = act(W @ x[b] + b) with W pre-padded (Op, Kp) bf16, b (Op, 1) f32.

    x_bkl: (B, K, L) f32 (NCHW feature map with flattened spatial lanes).
    Returns (B, Op, L) f32 -- lane-dense output, no layout transposes needed.
    """
    B, K, L = x_bkl.shape
    Op, Kp = w_p.shape
    TL = _lane_tile(L)
    Lp = _round_up(L, TL)
    xp = jnp.pad(x_bkl, ((0, 0), (0, Kp - K), (0, Lp - L))).astype(jnp.bfloat16)
    out = pl.pallas_call(
        partial(_wx_kernel, act=act),
        out_shape=jax.ShapeDtypeStruct((B, Op, Lp), jnp.float32),
        grid=(B, Lp // TL),
        in_specs=[
            pl.BlockSpec((Op, Kp), lambda b, l: (0, 0)),
            pl.BlockSpec((None, Kp, TL), lambda b, l: (b, 0, l)),
            pl.BlockSpec((Op, 1), lambda b, l: (0, 0)),
        ],
        out_specs=pl.BlockSpec((None, Op, TL), lambda b, l: (b, 0, l)),
        compiler_params=pltpu.CompilerParams(
            dimension_semantics=("parallel", "parallel"),
            vmem_limit_bytes=_VMEM_LIMIT),
        cost_estimate=pl.CostEstimate(
            flops=2 * B * Op * Kp * Lp,
            transcendentals=B * Op * Lp if act in _TRANSC else 0,
            bytes_accessed=B * Kp * Lp * 2 + Op * Kp * 2 + B * Op * Lp * 4),
    )(w_p, xp, b_p)
    return out[:, :, :L]


# ----------------------------------------------------------------------------
# Thin wrappers (layout plumbing + cheap glue kept in XLA)
# ----------------------------------------------------------------------------

def conv1x1(cp, x, o_out, act='none'):
    B, C, H, W = x.shape
    y = matmul_wx(x.reshape(B, C, H * W), cp['w'], cp['b'], act=act)
    return y[:, :o_out, :].reshape(B, o_out, H, W)


def conv7x7(cp, x, o_out, act='none'):
    """7x7 conv (padding=3) on a 2-channel input: 49 shifted views -> one
    lane-dense Pallas matmul (K = 2*49 = 98)."""
    B, C, H, W = x.shape
    xp = jnp.pad(x, ((0, 0), (0, 0), (3, 3), (3, 3)))
    taps = [xp[:, :, kh:kh + H, kw:kw + W] for kh in range(7) for kw in range(7)]
    patches = jnp.concatenate(taps, axis=1).reshape(B, C * 49, H * W)
    y = matmul_wx(patches, cp['w'], cp['b'], act=act)
    return y[:, :o_out, :].reshape(B, o_out, H, W)


def layer_norm(x, g, b, eps=1e-5):
    mean = jnp.mean(x, axis=-1, keepdims=True)
    var = jnp.mean(jnp.square(x - mean), axis=-1, keepdims=True)
    return (x - mean) * jax.lax.rsqrt(var + eps) * g + b


def avg_pool2(x):                                     # nn.AvgPool2d(2, stride=2)
    B, C, H, W = x.shape
    return x.reshape(B, C, H // 2, 2, W // 2, 2).mean(axis=(3, 5))


def upsample_nearest(x, s):                           # nn.Upsample(mode='nearest')
    return jnp.repeat(jnp.repeat(x, s, axis=2), s, axis=3)


def _interp1d_x2(p):
    """1-D bilinear x2 upsample along the last axis, matching
    F.interpolate(mode='bilinear', align_corners=False) column behaviour."""
    M = p.shape[-1]
    xs = jnp.maximum((jnp.arange(2 * M, dtype=jnp.float32) + 0.5) * 0.5 - 0.5, 0.0)
    x0 = jnp.clip(jnp.floor(xs).astype(jnp.int32), 0, M - 1)
    x1 = jnp.minimum(x0 + 1, M - 1)
    wx = xs - x0.astype(jnp.float32)
    return jnp.take(p, x0, axis=-1) * (1.0 - wx) + jnp.take(p, x1, axis=-1) * wx


# ----------------------------------------------------------------------------
# Module forwards (mirroring the PyTorch modules)
# ----------------------------------------------------------------------------

def fsa_forward(fp, x, num_heads):
    """FastSelfAttention.forward."""
    B, C, H, W = x.shape
    N = H * W
    h = num_heads
    assert N % 2 == 0
    scale = (C // h) ** (-0.5)

    # torch: x.reshape(B, H*W, C) -- a raw row-major reshape of the contiguous
    # NCHW tensor (NOT a channel transpose).  Same semantics in jnp.
    xs = x.reshape(B * N, C)

    # Fused [q | conv2d(1x1)] projection: the 1x1 conv + reshape/permute in the
    # reference is exactly a per-token Linear, so it shares one MXU pass with q.
    y1 = matmul_xw(xs, fp['w_qc'], fp['b_qc'], h + C)
    q = y1[:, :h].reshape(B, N, h)
    x_new = y1[:, h:].reshape(B, N, C)

    # alpha = softmax(q, dim=-1) acts on a singleton axis -> exactly 1.0, so
    # alpha * q == q.  torch.sum(dim=1) then sums over heads:
    q_glob = jnp.sum(q, axis=2)                                        # (B, N)

    # TODO(synk): LayerNorm + erf-GELU kept in XLA glue (erf lowering inside a
    # Mosaic kernel is not guaranteed); fold into the projection kernel later.
    x_new = layer_norm(x_new, fp['norm_g'], fp['norm_b'])
    x_act = jax.nn.gelu(x_new, approximate=False)                      # nn.GELU()

    # Fused [k | v] projection on the activated tokens (qkv_bias=False).
    y2 = matmul_xw(x_act.reshape(B * N, C), fp['w_kv'], fp['b_kv'], h + C)
    k = y2[:, :h].reshape(B, N, h)
    v = y2[:, h:].reshape(B, N, C)                                     # (B, N, C)

    # p[b,hd,n] = q_glob[b,n] * k[b,n,hd]   (torch: q(B,1,N,1) * k(B,hd,N,1))
    p = q_glob[:, None, :] * jnp.transpose(k, (0, 2, 1))               # (B, h, N)

    # belta = softmax(p, dim=-1) over a singleton axis == 1.0 exactly; the
    # AvgPool2d((2,1)) keeps it 1.0, so t = belta_pool @ p_pool^T has identical
    # rows: t[b,hd,i,j] = p_pool[b,hd,j].
    p_pool = 0.5 * (p[:, :, 0::2] + p[:, :, 1::2])                     # (B, h, N/2)

    # Bilinear x2 upsample of a row-constant matrix keeps rows constant (up to
    # 1-ulp regrouping of the row weights) -> only the column interp is needed.
    t_row = _interp1d_x2(p_pool)                                       # (B, h, N)

    # attention = softmax(t*scale, -1) is identical for every query row; after
    # the head sum and (attention @ v) every token shares one context row per
    # batch, so the (N, N) attention matrix never has to exist at all.
    # attention_drop / proj_drop: eval mode -> identity.
    attn_row = jnp.sum(jax.nn.softmax(t_row * scale, axis=-1), axis=1)  # (B, N)
    ctx = jnp.einsum('bn,bnc->bc', attn_row, v)                         # (B, C)

    ctx = matmul_xw(ctx, fp['w_proj'], fp['b_proj'], C)                 # proj
    out = jnp.broadcast_to(ctx[:, None, :], (B, N, C))
    # torch: x.reshape(B, C, H, W) -- raw reshape back, mirrored exactly.
    return out.reshape(B, C, H, W)


def cs_forward(cp, x1, x2):
    """CS.forward (channel squeeze-and-select)."""
    dim = x1.shape[1]
    x = x1 + x2
    sc = jnp.mean(x, axis=(2, 3))                       # AdaptiveAvgPool2d((1,1))
    zc = matmul_xw(sc, cp['w_fc1'], cp['b_fc1'], dim // 2)
    # BatchNorm1d, eval semantics: running_mean=0, running_var=1, eps=1e-5
    zc = zc * cp['bn_s'] + cp['bn_o']
    zc = jax.nn.relu(zc)
    z = matmul_xw(zc, cp['w_fc2'], cp['b_fc2'], dim, act='sigmoid')    # fused sigmoid
    z = z[:, :, None, None]
    return z * x1 + (1.0 - z) * x2


def gf_forward(P, x, *, num_heads):
    """Granularity_Fusion.forward."""
    B, dim, H, W = x.shape

    attn1 = fsa_forward(P['lk1'], x, num_heads)
    attn2 = avg_pool2(attn1)
    attn2 = fsa_forward(P['lk2'], attn2, num_heads)
    t = attn2
    attn2 = upsample_nearest(attn2, 2)
    attn3 = avg_pool2(t)
    attn3 = fsa_forward(P['lk3'], attn3, num_heads)
    attn3 = upsample_nearest(attn3, 4)

    ans = cs_forward(P['cs'], attn2, attn3)

    # conv0 is shared by the three branches: one batched Pallas call.
    u_all = conv1x1(P['conv0'],
                    jnp.concatenate([attn1, attn2, attn3], axis=0), dim // 3)
    u1, u2, u3 = u_all[:B], u_all[B:2 * B], u_all[2 * B:]
    u = jnp.concatenate([u1, u2, u3], axis=1)
    avg_u = jnp.mean(u, axis=1, keepdims=True)
    max_u = jnp.max(u, axis=1, keepdims=True)
    sa = jnp.concatenate([avg_u, max_u], axis=1)
    mask = conv7x7(P['conv1'], sa, 3, act='sigmoid')    # fused bias + sigmoid
    attn = (u1 * mask[:, 0:1] + u2 * mask[:, 1:2] + u3 * mask[:, 2:3])
    s = conv1x1(P['conv2'], attn, dim)
    s = s * x
    return s + ans


# ----------------------------------------------------------------------------
# Parameter init (PyTorch-default-style) and one-time packing for the kernels
# ----------------------------------------------------------------------------

class KeyGen:
    def __init__(self, key):
        self._key = key

    def __call__(self):
        self._key, sub = jax.random.split(self._key)
        return sub


def init_gf_params(key, dim, num_heads):
    kg = KeyGen(key)

    def linear(fan_in, fan_out, bias=True):
        bound = 1.0 / math.sqrt(fan_in)
        w = jax.random.uniform(kg(), (fan_out, fan_in), jnp.float32, -bound, bound)
        b = (jax.random.uniform(kg(), (fan_out,), jnp.float32, -bound, bound)
             if bias else jnp.zeros((fan_out,), jnp.float32))
        return {'w': w, 'b': b}

    def conv(cin, cout, k):
        bound = 1.0 / math.sqrt(cin * k * k)
        w = jax.random.uniform(kg(), (cout, cin, k, k), jnp.float32, -bound, bound)
        b = jax.random.uniform(kg(), (cout,), jnp.float32, -bound, bound)
        return {'w': w, 'b': b}

    def fsa():
        return {'q': linear(dim, num_heads, bias=False),
                'k': linear(dim, num_heads, bias=False),
                'v': linear(dim, dim, bias=False),
                'proj': linear(dim, dim),
                'conv2d': conv(dim, dim, 1),
                'norm_g': jnp.ones((dim,), jnp.float32),
                'norm_b': jnp.zeros((dim,), jnp.float32)}

    return {'lk1': fsa(), 'lk2': fsa(), 'lk3': fsa(),
            'conv0': conv(dim, dim // 3, 1),
            'conv1': conv(2, 3, 7),
            'conv2': conv(dim // 3, dim, 1),
            'cs': {'fc1': linear(dim, dim // 2),
                   'fc2': linear(dim // 2, dim),
                   'bn_g': jnp.ones((dim // 2,), jnp.float32),
                   'bn_b': jnp.zeros((dim // 2,), jnp.float32)}}


def _pad2(a, r, c):
    return jnp.pad(a, ((0, r - a.shape[0]), (0, c - a.shape[1])))


def _prep_xw(wT, b):
    """wT: (K, N) = torch_weight.T, b: (N,).  Pad to MXU-canonical, cast bf16."""
    K, N = wT.shape
    Kp, Np = _round_up(K, 128), _round_up(N, 128)
    return (_pad2(wT, Kp, Np).astype(jnp.bfloat16),
            jnp.pad(b, (0, Np - N)).astype(jnp.float32).reshape(1, Np))


def _prep_wx(w, b):
    """w: (O, K), b: (O,).  Pad to MXU-canonical, cast bf16."""
    O, K = w.shape
    Op, Kp = _round_up(O, 8), _round_up(K, 128)
    return (_pad2(w, Op, Kp).astype(jnp.bfloat16),
            jnp.pad(b, (0, Op - O)).astype(jnp.float32).reshape(Op, 1))


def prepare_params(raw, dim, num_heads):
    """One-time weight packing: fuse q|conv2d and k|v projections, pad, bf16."""
    h = num_heads

    def prep_fsa(f):
        w_qc = jnp.concatenate(
            [f['q']['w'].T, f['conv2d']['w'].reshape(dim, dim).T], axis=1)
        b_qc = jnp.concatenate(
            [jnp.zeros((h,), jnp.float32), f['conv2d']['b']])
        w_kv = jnp.concatenate([f['k']['w'].T, f['v']['w'].T], axis=1)
        b_kv = jnp.zeros((h + dim,), jnp.float32)
        wqc, bqc = _prep_xw(w_qc, b_qc)
        wkv, bkv = _prep_xw(w_kv, b_kv)
        wpj, bpj = _prep_xw(f['proj']['w'].T, f['proj']['b'])
        return dict(w_qc=wqc, b_qc=bqc, w_kv=wkv, b_kv=bkv,
                    w_proj=wpj, b_proj=bpj,
                    norm_g=f['norm_g'], norm_b=f['norm_b'])

    def prep_c1x1(c):
        O, Ci = c['w'].shape[0], c['w'].shape[1]
        w, b = _prep_wx(c['w'].reshape(O, Ci), c['b'])
        return dict(w=w, b=b)

    def prep_c7(c):
        O = c['w'].shape[0]
        w2 = jnp.transpose(c['w'], (0, 2, 3, 1)).reshape(O, -1)   # [o, kh, kw, c]
        w, b = _prep_wx(w2, c['b'])
        return dict(w=w, b=b)

    cs = raw['cs']
    w1, b1 = _prep_xw(cs['fc1']['w'].T, cs['fc1']['b'])
    w2, b2 = _prep_xw(cs['fc2']['w'].T, cs['fc2']['b'])
    cs_p = dict(w_fc1=w1, b_fc1=b1, w_fc2=w2, b_fc2=b2,
                bn_s=cs['bn_g'] / jnp.sqrt(1.0 + 1e-5),
                bn_o=cs['bn_b'])

    return dict(lk1=prep_fsa(raw['lk1']),
                lk2=prep_fsa(raw['lk2']),
                lk3=prep_fsa(raw['lk3']),
                conv0=prep_c1x1(raw['conv0']),
                conv1=prep_c7(raw['conv1']),
                conv2=prep_c1x1(raw['conv2']),
                cs=cs_p)


# ----------------------------------------------------------------------------

if __name__ == "__main__":
    # Small shapes consistent with the module: dim divisible by num_head, by 2
    # (CS), dim//3 > 0, and H*W even at every scale (full, /2, /4).
    B, dim, H, W = 2, 24, 16, 16
    num_heads = 4

    key = jax.random.PRNGKey(0)
    k_par, k_in = jax.random.split(key)

    raw_params = init_gf_params(k_par, dim, num_heads)
    params = prepare_params(raw_params, dim, num_heads)
    x = jax.random.normal(k_in, (B, dim, H, W), dtype=jnp.float32)

    fwd = jax.jit(partial(gf_forward, num_heads=num_heads))
    out = jax.block_until_ready(fwd(params, x))

    assert out.shape == (B, dim, H, W), out.shape
    assert bool(jnp.all(jnp.isfinite(out)))
    print("KERNEL_OK")
</pallas_src>

<mosaic_0001>
module attributes {stable_mosaic.version = 11 : i64} {
  func.func @_xw_kernel(%arg0: i32, %arg1: memref<512x128xbf16, #tpu.memory_space<vmem>>, %arg2: memref<128x128xbf16, #tpu.memory_space<vmem>>, %arg3: memref<1x128xf32, #tpu.memory_space<vmem>>, %arg4: memref<512x128xf32, #tpu.memory_space<vmem>>) attributes {dimension_semantics = [#tpu.dimension_semantics<parallel>], iteration_bounds = array<i64: 1>, scalar_prefetch = 0 : i64, scratch_operands = 0 : i64, tpu.core_type = #tpu.core_type<tc>, window_params = [{transform_indices = @transform_0, window_bounds = array<i64: 512, 128>}, {pipeline_mode = #tpu.pipeline_mode<synchronous>, transform_indices = @transform_1, window_bounds = array<i64: 128, 128>}, {pipeline_mode = #tpu.pipeline_mode<synchronous>, transform_indices = @transform_2, window_bounds = array<i64: 1, 128>}, {transform_indices = @transform_3, window_bounds = array<i64: 512, 128>}]} {
    %c0 = arith.constant 0 : index
    %c0_0 = arith.constant 0 : index
    %0 = vector.load %arg1[%c0, %c0_0] : memref<512x128xbf16, #tpu.memory_space<vmem>>, vector<512x128xbf16>
    %c0_1 = arith.constant 0 : index
    %c0_2 = arith.constant 0 : index
    %1 = vector.load %arg2[%c0_1, %c0_2] : memref<128x128xbf16, #tpu.memory_space<vmem>>, vector<128x128xbf16>
    %cst = arith.constant dense<0.000000e+00> : vector<512x128xf32>
    %2 = tpu.matmul %0, %1, %cst {dimension_numbers = #tpu.dot_dimension_numbers<[1], [0], [0], [1], [0, 0, 1, 1], [], []>} : vector<512x128xbf16>, vector<128x128xbf16>, vector<512x128xf32> -> vector<512x128xf32>
    %c0_3 = arith.constant 0 : index
    %c0_4 = arith.constant 0 : index
    %3 = vector.load %arg3[%c0_3, %c0_4] : memref<1x128xf32, #tpu.memory_space<vmem>>, vector<1x128xf32>
    %4 = vector.broadcast %3 : vector<1x128xf32> to vector<512x128xf32>
    %5 = arith.addf %2, %4 : vector<512x128xf32>
    %c0_5 = arith.constant 0 : index
    %c0_6 = arith.constant 0 : index
    %6 = vector.load %arg4[%c0_5, %c0_6] : memref<512x128xf32, #tpu.memory_space<vmem>>, vector<512x128xf32>
    tpu.vector_store %arg4[%c0_5, %c0_6], %5 {strides = array<i32>} : memref<512x128xf32, #tpu.memory_space<vmem>>, vector<512x128xf32>,
    return
  }
  func.func @transform_0(%arg0: i32) -> (i32, i32) {
    %c0_i32 = arith.constant 0 : i32
    %c0_i32_0 = arith.constant 0 : i32
    return %arg0, %c0_i32 : i32, i32
  }
  func.func @transform_1(%arg0: i32) -> (i32, i32) {
    %c0_i32 = arith.constant 0 : i32
    %c0_i32_0 = arith.constant 0 : i32
    %c0_i32_1 = arith.constant 0 : i32
    return %c0_i32, %c0_i32_0 : i32, i32
  }
  func.func @transform_2(%arg0: i32) -> (i32, i32) {
    %c0_i32 = arith.constant 0 : i32
    %c0_i32_0 = arith.constant 0 : i32
    %c0_i32_1 = arith.constant 0 : i32
    return %c0_i32, %c0_i32_0 : i32, i32
  }
  func.func @transform_3(%arg0: i32) -> (i32, i32) {
    %c0_i32 = arith.constant 0 : i32
    %c0_i32_0 = arith.constant 0 : i32
    return %arg0, %c0_i32 : i32, i32
  }
}

module attributes {stable_mosaic.version = 11 : i64} {
  func.func @_xw_kernel(%arg0: i32, %arg1: memref<8x128xbf16, #tpu.memory_space<vmem>>, %arg2: memref<128x128xbf16, #tpu.memory_space<vmem>>, %arg3: memref<1x128xf32, #tpu.memory_space<vmem>>, %arg4: memref<8x128xf32, #tpu.memory_space<vmem>>) attributes {dimension_semantics = [#tpu.dimension_semantics<parallel>], iteration_bounds = array<i64: 1>, scalar_prefetch = 0 : i64, scratch_operands = 0 : i64, tpu.core_type = #tpu.core_type<tc>, window_params = [{transform_indices = @transform_0, window_bounds = array<i64: 8, 128>}, {pipeline_mode = #tpu.pipeline_mode<synchronous>, transform_indices = @transform_1, window_bounds = array<i64: 128, 128>}, {pipeline_mode = #tpu.pipeline_mode<synchronous>, transform_indices = @transform_2, window_bounds = array<i64: 1, 128>}, {transform_indices = @transform_3, window_bounds = array<i64: 8, 128>}]} {
    %c0 = arith.constant 0 : index
    %c0_0 = arith.constant 0 : index
    %0 = vector.load %arg1[%c0, %c0_0] : memref<8x128xbf16, #tpu.memory_space<vmem>>, vector<8x128xbf16>
    %c0_1 = arith.constant 0 : index
    %c0_2 = arith.constant 0 : index
    %1 = vector.load %arg2[%c0_1, %c0_2] : memref<128x128xbf16, #tpu.memory_space<vmem>>, vector<128x128xbf16>
    %cst = arith.constant dense<0.000000e+00> : vector<8x128xf32>
    %2 = tpu.matmul %0, %1, %cst {dimension_numbers = #tpu.dot_dimension_numbers<[1], [0], [0], [1], [0, 0, 1, 1], [], []>} : vector<8x128xbf16>, vector<128x128xbf16>, vector<8x128xf32> -> vector<8x128xf32>
    %c0_3 = arith.constant 0 : index
    %c0_4 = arith.constant 0 : index
    %3 = vector.load %arg3[%c0_3, %c0_4] : memref<1x128xf32, #tpu.memory_space<vmem>>, vector<1x128xf32>
    %4 = vector.broadcast %3 : vector<1x128xf32> to vector<8x128xf32>
    %5 = arith.addf %2, %4 : vector<8x128xf32>
    %c0_5 = arith.constant 0 : index
    %c0_6 = arith.constant 0 : index
    %6 = vector.load %arg4[%c0_5, %c0_6] : memref<8x128xf32, #tpu.memory_space<vmem>>, vector<8x128xf32>
    tpu.vector_store %arg4[%c0_5, %c0_6], %5 {strides = array<i32>} : memref<8x128xf32, #tpu.memory_space<vmem>>, vector<8x128xf32>,
    return
  }
  func.func @transform_0(%arg0: i32) -> (i32, i32) {
    %c0_i32 = arith.constant 0 : i32
    %c0_i32_0 = arith.constant 0 : i32
    return %arg0, %c0_i32 : i32, i32
  }
  func.func @transform_1(%arg0: i32) -> (i32, i32) {
    %c0_i32 = arith.constant 0 : i32
    %c0_i32_0 = arith.constant 0 : i32
    %c0_i32_1 = arith.constant 0 : i32
    return %c0_i32, %c0_i32_0 : i32, i32
  }
  func.func @transform_2(%arg0: i32) -> (i32, i32) {
    %c0_i32 = arith.constant 0 : i32
    %c0_i32_0 = arith.constant 0 : i32
    %c0_i32_1 = arith.constant 0 : i32
    return %c0_i32, %c0_i32_0 : i32, i32
  }
  func.func @transform_3(%arg0: i32) -> (i32, i32) {
    %c0_i32 = arith.constant 0 : i32
    %c0_i32_0 = arith.constant 0 : i32
    return %arg0, %c0_i32 : i32, i32
  }
}

module attributes {stable_mosaic.version = 11 : i64} {
  func.func @_xw_kernel(%arg0: i32, %arg1: memref<128x128xbf16, #tpu.memory_space<vmem>>, %arg2: memref<128x128xbf16, #tpu.memory_space<vmem>>, %arg3: memref<1x128xf32, #tpu.memory_space<vmem>>, %arg4: memref<128x128xf32, #tpu.memory_space<vmem>>) attributes {dimension_semantics = [#tpu.dimension_semantics<parallel>], iteration_bounds = array<i64: 1>, scalar_prefetch = 0 : i64, scratch_operands = 0 : i64, tpu.core_type = #tpu.core_type<tc>, window_params = [{transform_indices = @transform_0, window_bounds = array<i64: 128, 128>}, {pipeline_mode = #tpu.pipeline_mode<synchronous>, transform_indices = @transform_1, window_bounds = array<i64: 128, 128>}, {pipeline_mode = #tpu.pipeline_mode<synchronous>, transform_indices = @transform_2, window_bounds = array<i64: 1, 128>}, {transform_indices = @transform_3, window_bounds = array<i64: 128, 128>}]} {
    %c0 = arith.constant 0 : index
    %c0_0 = arith.constant 0 : index
    %0 = vector.load %arg1[%c0, %c0_0] : memref<128x128xbf16, #tpu.memory_space<vmem>>, vector<128x128xbf16>
    %c0_1 = arith.constant 0 : index
    %c0_2 = arith.constant 0 : index
    %1 = vector.load %arg2[%c0_1, %c0_2] : memref<128x128xbf16, #tpu.memory_space<vmem>>, vector<128x128xbf16>
    %cst = arith.constant dense<0.000000e+00> : vector<128x128xf32>
    %2 = tpu.matmul %0, %1, %cst {dimension_numbers = #tpu.dot_dimension_numbers<[1], [0], [0], [1], [0, 0, 1, 1], [], []>} : vector<128x128xbf16>, vector<128x128xbf16>, vector<128x128xf32> -> vector<128x128xf32>
    %c0_3 = arith.constant 0 : index
    %c0_4 = arith.constant 0 : index
    %3 = vector.load %arg3[%c0_3, %c0_4] : memref<1x128xf32, #tpu.memory_space<vmem>>, vector<1x128xf32>
    %4 = vector.broadcast %3 : vector<1x128xf32> to vector<128x128xf32>
    %5 = arith.addf %2, %4 : vector<128x128xf32>
    %c0_5 = arith.constant 0 : index
    %c0_6 = arith.constant 0 : index
    %6 = vector.load %arg4[%c0_5, %c0_6] : memref<128x128xf32, #tpu.memory_space<vmem>>, vector<128x128xf32>
    tpu.vector_store %arg4[%c0_5, %c0_6], %5 {strides = array<i32>} : memref<128x128xf32, #tpu.memory_space<vmem>>, vector<128x128xf32>,
    return
  }
  func.func @transform_0(%arg0: i32) -> (i32, i32) {
    %c0_i32 = arith.constant 0 : i32
    %c0_i32_0 = arith.constant 0 : i32
    return %arg0, %c0_i32 : i32, i32
  }
  func.func @transform_1(%arg0: i32) -> (i32, i32) {
    %c0_i32 = arith.constant 0 : i32
    %c0_i32_0 = arith.constant 0 : i32
    %c0_i32_1 = arith.constant 0 : i32
    return %c0_i32, %c0_i32_0 : i32, i32
  }
  func.func @transform_2(%arg0: i32) -> (i32, i32) {
    %c0_i32 = arith.constant 0 : i32
    %c0_i32_0 = arith.constant 0 : i32
    %c0_i32_1 = arith.constant 0 : i32
    return %c0_i32, %c0_i32_0 : i32, i32
  }
  func.func @transform_3(%arg0: i32) -> (i32, i32) {
    %c0_i32 = arith.constant 0 : i32
    %c0_i32_0 = arith.constant 0 : i32
    return %arg0, %c0_i32 : i32, i32
  }
}

module attributes {stable_mosaic.version = 11 : i64} {
  func.func @_xw_kernel(%arg0: i32, %arg1: memref<32x128xbf16, #tpu.memory_space<vmem>>, %arg2: memref<128x128xbf16, #tpu.memory_space<vmem>>, %arg3: memref<1x128xf32, #tpu.memory_space<vmem>>, %arg4: memref<32x128xf32, #tpu.memory_space<vmem>>) attributes {dimension_semantics = [#tpu.dimension_semantics<parallel>], iteration_bounds = array<i64: 1>, scalar_prefetch = 0 : i64, scratch_operands = 0 : i64, tpu.core_type = #tpu.core_type<tc>, window_params = [{transform_indices = @transform_0, window_bounds = array<i64: 32, 128>}, {pipeline_mode = #tpu.pipeline_mode<synchronous>, transform_indices = @transform_1, window_bounds = array<i64: 128, 128>}, {pipeline_mode = #tpu.pipeline_mode<synchronous>, transform_indices = @transform_2, window_bounds = array<i64: 1, 128>}, {transform_indices = @transform_3, window_bounds = array<i64: 32, 128>}]} {
    %c0 = arith.constant 0 : index
    %c0_0 = arith.constant 0 : index
    %0 = vector.load %arg1[%c0, %c0_0] : memref<32x128xbf16, #tpu.memory_space<vmem>>, vector<32x128xbf16>
    %c0_1 = arith.constant 0 : index
    %c0_2 = arith.constant 0 : index
    %1 = vector.load %arg2[%c0_1, %c0_2] : memref<128x128xbf16, #tpu.memory_space<vmem>>, vector<128x128xbf16>
    %cst = arith.constant dense<0.000000e+00> : vector<32x128xf32>
    %2 = tpu.matmul %0, %1, %cst {dimension_numbers = #tpu.dot_dimension_numbers<[1], [0], [0], [1], [0, 0, 1, 1], [], []>} : vector<32x128xbf16>, vector<128x128xbf16>, vector<32x128xf32> -> vector<32x128xf32>
    %c0_3 = arith.constant 0 : index
    %c0_4 = arith.constant 0 : index
    %3 = vector.load %arg3[%c0_3, %c0_4] : memref<1x128xf32, #tpu.memory_space<vmem>>, vector<1x128xf32>
    %4 = vector.broadcast %3 : vector<1x128xf32> to vector<32x128xf32>
    %5 = arith.addf %2, %4 : vector<32x128xf32>
    %c0_5 = arith.constant 0 : index
    %c0_6 = arith.constant 0 : index
    %6 = vector.load %arg4[%c0_5, %c0_6] : memref<32x128xf32, #tpu.memory_space<vmem>>, vector<32x128xf32>
    tpu.vector_store %arg4[%c0_5, %c0_6], %5 {strides = array<i32>} : memref<32x128xf32, #tpu.memory_space<vmem>>, vector<32x128xf32>,
    return
  }
  func.func @transform_0(%arg0: i32) -> (i32, i32) {
    %c0_i32 = arith.constant 0 : i32
    %c0_i32_0 = arith.constant 0 : i32
    return %arg0, %c0_i32 : i32, i32
  }
  func.func @transform_1(%arg0: i32) -> (i32, i32) {
    %c0_i32 = arith.constant 0 : i32
    %c0_i32_0 = arith.constant 0 : i32
    %c0_i32_1 = arith.constant 0 : i32
    return %c0_i32, %c0_i32_0 : i32, i32
  }
  func.func @transform_2(%arg0: i32) -> (i32, i32) {
    %c0_i32 = arith.constant 0 : i32
    %c0_i32_0 = arith.constant 0 : i32
    %c0_i32_1 = arith.constant 0 : i32
    return %c0_i32, %c0_i32_0 : i32, i32
  }
  func.func @transform_3(%arg0: i32) -> (i32, i32) {
    %c0_i32 = arith.constant 0 : i32
    %c0_i32_0 = arith.constant 0 : i32
    return %arg0, %c0_i32 : i32, i32
  }
}

module attributes {stable_mosaic.version = 11 : i64} {
  func.func @_xw_kernel(%arg0: i32, %arg1: memref<8x128xbf16, #tpu.memory_space<vmem>>, %arg2: memref<128x128xbf16, #tpu.memory_space<vmem>>, %arg3: memref<1x128xf32, #tpu.memory_space<vmem>>, %arg4: memref<8x128xf32, #tpu.memory_space<vmem>>) attributes {dimension_semantics = [#tpu.dimension_semantics<parallel>], iteration_bounds = array<i64: 1>, scalar_prefetch = 0 : i64, scratch_operands = 0 : i64, tpu.core_type = #tpu.core_type<tc>, window_params = [{transform_indices = @transform_0, window_bounds = array<i64: 8, 128>}, {pipeline_mode = #tpu.pipeline_mode<synchronous>, transform_indices = @transform_1, window_bounds = array<i64: 128, 128>}, {pipeline_mode = #tpu.pipeline_mode<synchronous>, transform_indices = @transform_2, window_bounds = array<i64: 1, 128>}, {transform_indices = @transform_3, window_bounds = array<i64: 8, 128>}]} {
    %c0 = arith.constant 0 : index
    %c0_0 = arith.constant 0 : index
    %0 = vector.load %arg1[%c0, %c0_0] : memref<8x128xbf16, #tpu.memory_space<vmem>>, vector<8x128xbf16>
    %c0_1 = arith.constant 0 : index
    %c0_2 = arith.constant 0 : index
    %1 = vector.load %arg2[%c0_1, %c0_2] : memref<128x128xbf16, #tpu.memory_space<vmem>>, vector<128x128xbf16>
    %cst = arith.constant dense<0.000000e+00> : vector<8x128xf32>
    %2 = tpu.matmul %0, %1, %cst {dimension_numbers = #tpu.dot_dimension_numbers<[1], [0], [0], [1], [0, 0, 1, 1], [], []>} : vector<8x128xbf16>, vector<128x128xbf16>, vector<8x128xf32> -> vector<8x128xf32>
    %c0_3 = arith.constant 0 : index
    %c0_4 = arith.constant 0 : index
    %3 = vector.load %arg3[%c0_3, %c0_4] : memref<1x128xf32, #tpu.memory_space<vmem>>, vector<1x128xf32>
    %4 = vector.broadcast %3 : vector<1x128xf32> to vector<8x128xf32>
    %5 = arith.addf %2, %4 : vector<8x128xf32>
    %6 = arith.negf %5 : vector<8x128xf32>
    %7 = math.exp %6 : vector<8x128xf32>
    %cst_5 = arith.constant 1.000000e+00 : f32
    %8 = vector.broadcast %cst_5 : f32 to vector<8x128xf32>
    %9 = arith.addf %8, %7 : vector<8x128xf32>
    %10 = arith.divf %8, %9 : vector<8x128xf32>
    %c0_6 = arith.constant 0 : index
    %c0_7 = arith.constant 0 : index
    %11 = vector.load %arg4[%c0_6, %c0_7] : memref<8x128xf32, #tpu.memory_space<vmem>>, vector<8x128xf32>
    tpu.vector_store %arg4[%c0_6, %c0_7], %10 {strides = array<i32>} : memref<8x128xf32, #tpu.memory_space<vmem>>, vector<8x128xf32>,
    return
  }
  func.func @transform_0(%arg0: i32) -> (i32, i32) {
    %c0_i32 = arith.constant 0 : i32
    %c0_i32_0 = arith.constant 0 : i32
    return %arg0, %c0_i32 : i32, i32
  }
  func.func @transform_1(%arg0: i32) -> (i32, i32) {
    %c0_i32 = arith.constant 0 : i32
    %c0_i32_0 = arith.constant 0 : i32
    %c0_i32_1 = arith.constant 0 : i32
    return %c0_i32, %c0_i32_0 : i32, i32
  }
  func.func @transform_2(%arg0: i32) -> (i32, i32) {
    %c0_i32 = arith.constant 0 : i32
    %c0_i32_0 = arith.constant 0 : i32
    %c0_i32_1 = arith.constant 0 : i32
    return %c0_i32, %c0_i32_0 : i32, i32
  }
  func.func @transform_3(%arg0: i32) -> (i32, i32) {
    %c0_i32 = arith.constant 0 : i32
    %c0_i32_0 = arith.constant 0 : i32
    return %arg0, %c0_i32 : i32, i32
  }
}

module attributes {stable_mosaic.version = 11 : i64} {
  func.func @_wx_kernel(%arg0: i32, %arg1: i32, %arg2: memref<8x128xbf16, #tpu.memory_space<vmem>>, %arg3: memref<1x128x256xbf16, #tpu.memory_space<vmem>>, %arg4: memref<8x1xf32, #tpu.memory_space<vmem>>, %arg5: memref<1x8x256xf32, #tpu.memory_space<vmem>>) attributes {dimension_semantics = [#tpu.dimension_semantics<parallel>, #tpu.dimension_semantics<parallel>], iteration_bounds = array<i64: 6, 1>, scalar_prefetch = 0 : i64, scratch_operands = 0 : i64, tpu.core_type = #tpu.core_type<tc>, window_params = [{pipeline_mode = #tpu.pipeline_mode<synchronous>, transform_indices = @transform_0, window_bounds = array<i64: 8, 128>}, {transform_indices = @transform_1, window_bounds = array<i64: 1, 128, 256>}, {pipeline_mode = #tpu.pipeline_mode<synchronous>, transform_indices = @transform_2, window_bounds = array<i64: 8, 1>}, {transform_indices = @transform_3, window_bounds = array<i64: 1, 8, 256>}]} {
    %c0 = arith.constant 0 : index
    %c0_0 = arith.constant 0 : index
    %0 = vector.load %arg2[%c0, %c0_0] : memref<8x128xbf16, #tpu.memory_space<vmem>>, vector<8x128xbf16>
    %c0_1 = arith.constant 0 : index
    %c0_2 = arith.constant 0 : index
    %c0_3 = arith.constant 0 : index
    %1 = vector.load %arg3[%c0_1, %c0_2, %c0_3] : memref<1x128x256xbf16, #tpu.memory_space<vmem>>, vector<1x128x256xbf16>
    %2 = vector.shape_cast %1 : vector<1x128x256xbf16> to vector<128x256xbf16>
    %cst = arith.constant dense<0.000000e+00> : vector<8x256xf32>
    %3 = tpu.matmul %0, %2, %cst {dimension_numbers = #tpu.dot_dimension_numbers<[1], [0], [0], [1], [0, 0, 1, 1], [], []>} : vector<8x128xbf16>, vector<128x256xbf16>, vector<8x256xf32> -> vector<8x256xf32>
    %c0_4 = arith.constant 0 : index
    %c0_5 = arith.constant 0 : index
    %4 = vector.load %arg4[%c0_4, %c0_5] : memref<8x1xf32, #tpu.memory_space<vmem>>, vector<8x1xf32>
    %5 = vector.broadcast %4 : vector<8x1xf32> to vector<8x256xf32>
    %6 = arith.addf %3, %5 : vector<8x256xf32>
    %c0_6 = arith.constant 0 : index
    %c0_7 = arith.constant 0 : index
    %c0_8 = arith.constant 0 : index
    %7 = vector.load %arg5[%c0_6, %c0_7, %c0_8] : memref<1x8x256xf32, #tpu.memory_space<vmem>>, vector<1x8x256xf32>
    %8 = vector.shape_cast %7 : vector<1x8x256xf32> to vector<8x256xf32>
    %9 = vector.shape_cast %6 : vector<8x256xf32> to vector<1x8x256xf32>
    tpu.vector_store %arg5[%c0_6, %c0_7, %c0_8], %9 {strides = array<i32>} : memref<1x8x256xf32, #tpu.memory_space<vmem>>, vector<1x8x256xf32>,
    return
  }
  func.func @transform_0(%arg0: i32, %arg1: i32) -> (i32, i32) {
    %c0_i32 = arith.constant 0 : i32
    %c0_i32_0 = arith.constant 0 : i32
    %c0_i32_1 = arith.constant 0 : i32
    return %c0_i32, %c0_i32_0 : i32, i32
  }
  func.func @transform_1(%arg0: i32, %arg1: i32) -> (i32, i32, i32) {
    %c0_i32 = arith.constant 0 : i32
    %c0_i32_0 = arith.constant 0 : i32
    return %arg0, %c0_i32, %arg1 : i32, i32, i32
  }
  func.func @transform_2(%arg0: i32, %arg1: i32) -> (i32, i32) {
    %c0_i32 = arith.constant 0 : i32
    %c0_i32_0 = arith.constant 0 : i32
    %c0_i32_1 = arith.constant 0 : i32
    return %c0_i32, %c0_i32_0 : i32, i32
  }
  func.func @transform_3(%arg0: i32, %arg1: i32) -> (i32, i32, i32) {
    %c0_i32 = arith.constant 0 : i32
    %c0_i32_0 = arith.constant 0 : i32
    return %arg0, %c0_i32, %arg1 : i32, i32, i32
  }
}

module attributes {stable_mosaic.version = 11 : i64} {
  func.func @_wx_kernel(%arg0: i32, %arg1: i32, %arg2: memref<8x128xbf16, #tpu.memory_space<vmem>>, %arg3: memref<1x128x256xbf16, #tpu.memory_space<vmem>>, %arg4: memref<8x1xf32, #tpu.memory_space<vmem>>, %arg5: memref<1x8x256xf32, #tpu.memory_space<vmem>>) attributes {dimension_semantics = [#tpu.dimension_semantics<parallel>, #tpu.dimension_semantics<parallel>], iteration_bounds = array<i64: 2, 1>, scalar_prefetch = 0 : i64, scratch_operands = 0 : i64, tpu.core_type = #tpu.core_type<tc>, window_params = [{pipeline_mode = #tpu.pipeline_mode<synchronous>, transform_indices = @transform_0, window_bounds = array<i64: 8, 128>}, {transform_indices = @transform_1, window_bounds = array<i64: 1, 128, 256>}, {pipeline_mode = #tpu.pipeline_mode<synchronous>, transform_indices = @transform_2, window_bounds = array<i64: 8, 1>}, {transform_indices = @transform_3, window_bounds = array<i64: 1, 8, 256>}]} {
    %c0 = arith.constant 0 : index
    %c0_0 = arith.constant 0 : index
    %0 = vector.load %arg2[%c0, %c0_0] : memref<8x128xbf16, #tpu.memory_space<vmem>>, vector<8x128xbf16>
    %c0_1 = arith.constant 0 : index
    %c0_2 = arith.constant 0 : index
    %c0_3 = arith.constant 0 : index
    %1 = vector.load %arg3[%c0_1, %c0_2, %c0_3] : memref<1x128x256xbf16, #tpu.memory_space<vmem>>, vector<1x128x256xbf16>
    %2 = vector.shape_cast %1 : vector<1x128x256xbf16> to vector<128x256xbf16>
    %cst = arith.constant dense<0.000000e+00> : vector<8x256xf32>
    %3 = tpu.matmul %0, %2, %cst {dimension_numbers = #tpu.dot_dimension_numbers<[1], [0], [0], [1], [0, 0, 1, 1], [], []>} : vector<8x128xbf16>, vector<128x256xbf16>, vector<8x256xf32> -> vector<8x256xf32>
    %c0_4 = arith.constant 0 : index
    %c0_5 = arith.constant 0 : index
    %4 = vector.load %arg4[%c0_4, %c0_5] : memref<8x1xf32, #tpu.memory_space<vmem>>, vector<8x1xf32>
    %5 = vector.broadcast %4 : vector<8x1xf32> to vector<8x256xf32>
    %6 = arith.addf %3, %5 : vector<8x256xf32>
    %7 = arith.negf %6 : vector<8x256xf32>
    %8 = math.exp %7 : vector<8x256xf32>
    %cst_6 = arith.constant 1.000000e+00 : f32
    %9 = vector.broadcast %cst_6 : f32 to vector<8x256xf32>
    %10 = arith.addf %9, %8 : vector<8x256xf32>
    %11 = arith.divf %9, %10 : vector<8x256xf32>
    %c0_7 = arith.constant 0 : index
    %c0_8 = arith.constant 0 : index
    %c0_9 = arith.constant 0 : index
    %12 = vector.load %arg5[%c0_7, %c0_8, %c0_9] : memref<1x8x256xf32, #tpu.memory_space<vmem>>, vector<1x8x256xf32>
    %13 = vector.shape_cast %12 : vector<1x8x256xf32> to vector<8x256xf32>
    %14 = vector.shape_cast %11 : vector<8x256xf32> to vector<1x8x256xf32>
    tpu.vector_store %arg5[%c0_7, %c0_8, %c0_9], %14 {strides = array<i32>} : memref<1x8x256xf32, #tpu.memory_space<vmem>>, vector<1x8x256xf32>,
    return
  }
  func.func @transform_0(%arg0: i32, %arg1: i32) -> (i32, i32) {
    %c0_i32 = arith.constant 0 : i32
    %c0_i32_0 = arith.constant 0 : i32
    %c0_i32_1 = arith.constant 0 : i32
    return %c0_i32, %c0_i32_0 : i32, i32
  }
  func.func @transform_1(%arg0: i32, %arg1: i32) -> (i32, i32, i32) {
    %c0_i32 = arith.constant 0 : i32
    %c0_i32_0 = arith.constant 0 : i32
    return %arg0, %c0_i32, %arg1 : i32, i32, i32
  }
  func.func @transform_2(%arg0: i32, %arg1: i32) -> (i32, i32) {
    %c0_i32 = arith.constant 0 : i32
    %c0_i32_0 = arith.constant 0 : i32
    %c0_i32_1 = arith.constant 0 : i32
    return %c0_i32, %c0_i32_0 : i32, i32
  }
  func.func @transform_3(%arg0: i32, %arg1: i32) -> (i32, i32, i32) {
    %c0_i32 = arith.constant 0 : i32
    %c0_i32_0 = arith.constant 0 : i32
    return %arg0, %c0_i32, %arg1 : i32, i32, i32
  }
}

module attributes {stable_mosaic.version = 11 : i64} {
  func.func @_wx_kernel(%arg0: i32, %arg1: i32, %arg2: memref<24x128xbf16, #tpu.memory_space<vmem>>, %arg3: memref<1x128x256xbf16, #tpu.memory_space<vmem>>, %arg4: memref<24x1xf32, #tpu.memory_space<vmem>>, %arg5: memref<1x24x256xf32, #tpu.memory_space<vmem>>) attributes {dimension_semantics = [#tpu.dimension_semantics<parallel>, #tpu.dimension_semantics<parallel>], iteration_bounds = array<i64: 2, 1>, scalar_prefetch = 0 : i64, scratch_operands = 0 : i64, tpu.core_type = #tpu.core_type<tc>, window_params = [{pipeline_mode = #tpu.pipeline_mode<synchronous>, transform_indices = @transform_0, window_bounds = array<i64: 24, 128>}, {transform_indices = @transform_1, window_bounds = array<i64: 1, 128, 256>}, {pipeline_mode = #tpu.pipeline_mode<synchronous>, transform_indices = @transform_2, window_bounds = array<i64: 24, 1>}, {transform_indices = @transform_3, window_bounds = array<i64: 1, 24, 256>}]} {
    %c0 = arith.constant 0 : index
    %c0_0 = arith.constant 0 : index
    %0 = vector.load %arg2[%c0, %c0_0] : memref<24x128xbf16, #tpu.memory_space<vmem>>, vector<24x128xbf16>
    %c0_1 = arith.constant 0 : index
    %c0_2 = arith.constant 0 : index
    %c0_3 = arith.constant 0 : index
    %1 = vector.load %arg3[%c0_1, %c0_2, %c0_3] : memref<1x128x256xbf16, #tpu.memory_space<vmem>>, vector<1x128x256xbf16>
    %2 = vector.shape_cast %1 : vector<1x128x256xbf16> to vector<128x256xbf16>
    %cst = arith.constant dense<0.000000e+00> : vector<24x256xf32>
    %3 = tpu.matmul %0, %2, %cst {dimension_numbers = #tpu.dot_dimension_numbers<[1], [0], [0], [1], [0, 0, 1, 1], [], []>} : vector<24x128xbf16>, vector<128x256xbf16>, vector<24x256xf32> -> vector<24x256xf32>
    %c0_4 = arith.constant 0 : index
    %c0_5 = arith.constant 0 : index
    %4 = vector.load %arg4[%c0_4, %c0_5] : memref<24x1xf32, #tpu.memory_space<vmem>>, vector<24x1xf32>
    %5 = vector.broadcast %4 : vector<24x1xf32> to vector<24x256xf32>
    %6 = arith.addf %3, %5 : vector<24x256xf32>
    %c0_6 = arith.constant 0 : index
    %c0_7 = arith.constant 0 : index
    %c0_8 = arith.constant 0 : index
    %7 = vector.load %arg5[%c0_6, %c0_7, %c0_8] : memref<1x24x256xf32, #tpu.memory_space<vmem>>, vector<1x24x256xf32>
    %8 = vector.shape_cast %7 : vector<1x24x256xf32> to vector<24x256xf32>
    %9 = vector.shape_cast %6 : vector<24x256xf32> to vector<1x24x256xf32>
    tpu.vector_store %arg5[%c0_6, %c0_7, %c0_8], %9 {strides = array<i32>} : memref<1x24x256xf32, #tpu.memory_space<vmem>>, vector<1x24x256xf32>,
    return
  }
  func.func @transform_0(%arg0: i32, %arg1: i32) -> (i32, i32) {
    %c0_i32 = arith.constant 0 : i32
    %c0_i32_0 = arith.constant 0 : i32
    %c0_i32_1 = arith.constant 0 : i32
    return %c0_i32, %c0_i32_0 : i32, i32
  }
  func.func @transform_1(%arg0: i32, %arg1: i32) -> (i32, i32, i32) {
    %c0_i32 = arith.constant 0 : i32
    %c0_i32_0 = arith.constant 0 : i32
    return %arg0, %c0_i32, %arg1 : i32, i32, i32
  }
  func.func @transform_2(%arg0: i32, %arg1: i32) -> (i32, i32) {
    %c0_i32 = arith.constant 0 : i32
    %c0_i32_0 = arith.constant 0 : i32
    %c0_i32_1 = arith.constant 0 : i32
    return %c0_i32, %c0_i32_0 : i32, i32
  }
  func.func @transform_3(%arg0: i32, %arg1: i32) -> (i32, i32, i32) {
    %c0_i32 = arith.constant 0 : i32
    %c0_i32_0 = arith.constant 0 : i32
    return %arg0, %c0_i32, %arg1 : i32, i32, i32
  }
}

</mosaic_0001>

<bundles_post_ra>
// kernel: mul.139
= control target key start
LH: loop header
LB: loop body
LE: loop exit
PB: predicated region body
PF: predicated region fallthrough
CT: control target
= control target key end

     0   :  { %s42_s0 = inlined_call_operand.vmem [shape: f32[512], index: 0, kind: input, shape index: {}]   ;;  %s43_s1 = inlined_call_operand.vmem [shape: f32[2,256], index: 1, kind: output, shape index: {}]  }
   0x1   :  { %v4_v0 = vld [vmem:[%s42_s0] sm:$0xf] }
   0x2   :  { %5 = vst [vmem:[#allocation1] sm:$0xf] %v4_v0 }
   0x9   :  { %v6_v1 = vld [vmem:[#allocation1] sm:$0xf]  }
   0xa   :  { %7 = vst [vmem:[#allocation0] ss:$8 sm:$0x3] %v6_v1  }
   0xb   :  { %9 = vst [vmem:[#allocation0 - $0xf] ss:$8 sm:$0xc] %v6_v1  }
  0x12   :  { %v12_v2 = vld [vmem:[#allocation0] sm:$0x3]  ;;  %v17_v3 = vld [vmem:[#allocation0 + $0x8] sm:$0x3] }
  0x13   :  { %15 = vst [vmem:[%s43_s1] sm:$0x3] %v12_v2 }
  0x14   :  { %22 = vst [vmem:[%s43_s1 + $0x2] sm:$0x3] %v17_v3 }

// kernel: gf_forward.14
= control target key start
LH: loop header
LB: loop body
LE: loop exit
PB: predicated region body
PF: predicated region fallthrough
CT: control target
= control target key end

     0   :  { %8 = vsyncpa [#allocation3], 0  ;;  %s1272_s0 = inlined_call_operand.vmem [shape: bf16[512,128], index: 0, kind: input, shape index: {}]   ;;  %s1273_s1 = inlined_call_operand.hbm [shape: bf16[128,128], index: 1, kind: input, shape index: {}]   ;;  %s1274_s2 = inlined_call_operand.hbm [shape: f32[1,128], index: 2, kind: input, shape index: {}]   ;;  %s1275_s3 = inlined_call_operand.vmem [shape: f32[512,128], index: 3, kind: output, shape index: {}]  }
   0x1   :  { %s16_s14 = sshll.u32 %s1273_s1, 4  ;;  %s17_s14 = int_to_ptr.hbm [resolvable:$true] %s16_s14 }
   0x2   :  { %9 = vsyncpa [#allocation5], 0  ;;  %s888_s15 = smov [#allocation2]   ;;  %s30_s19 = sshll.u32 %s1274_s2, 4  ;;  %s31_s19 = int_to_ptr.hbm [resolvable:$true] %s30_s19 }
   0x3   :  { %s18_s16 = sshll.u32 %s888_s15, 4  ;;  %s889_s20 = smov 64   ;;  %s19_s16 = int_to_ptr.vmem [resolvable:$true] %s18_s16 }
   0x4   :  { %s890_s21 = smov 4   ;;  %s891_s22 = smov [#allocation4]  }
   0x5   :  { %24 = dma.hbm_to_vmem [thread:$0]  %s17_s14, 1024, %s19_s16, [#allocation3], %s889_s20, %s889_s20, %s890_s21  }
   0x6   :  { %s32_s23 = sshll.u32 %s891_s22, 4  ;;  %s33_s23 = int_to_ptr.vmem [resolvable:$true] %s32_s23 }
   0x7   :  { %35 = dma.hbm_to_vmem [thread:$0]  %s31_s19, 16, %s33_s23, [#allocation5]  }
   0x8   :  { %884 = dma.done.wait [#allocation3], 1024  }
   0x9   :  { %885 = vsyncadd [#allocation3], 4294966272 }
   0xa   :  { %886 = dma.done.wait [#allocation5], 16  }
   0xb   :  { %887 = vsyncadd [#allocation5], 4294967280  ;;  %v806_v0 = vld [vmem:[#allocation2 + $0x38] sm:$0xff]  ;;  %v805_v1 = vld [vmem:[#allocation2 + $0x30] sm:$0xff] }
   0xc   :  { %368 = vmatpush.bf16.msra.mxu0 %v806_v0  ;;  %807 = vmatpush.bf16.msra.mxu1 %v806_v0  ;;  %v804_v2 = vld [vmem:[#allocation2 + $0x28] sm:$0xff]  ;;  %v803_v3 = vld [vmem:[#allocation2 + $0x20] sm:$0xff]  ;;  %v802_v4 = vld [vmem:[#allocation2 + $0x18] sm:$0xff] }
   0xd   :  { %808 = vmatpush.bf16.msra.mxu2 %v806_v0  ;;  %809 = vmatpush.bf16.msra.mxu3 %v806_v0  ;;  %v801_v5 = vld [vmem:[#allocation2 + $0x10] sm:$0xff]  ;;  %v800_v6 = vld [vmem:[#allocation2 + $0x8] sm:$0xff]  ;;  %v799_v7 = vld [vmem:[#allocation2] sm:$0xff] }
   0xe   :  { %v767_v8 = vld [vmem:[%s1272_s0] sm:$0xff]  ;;  %v768_v12 = vld [vmem:[%s1272_s0 + $0x8] sm:$0xff]  ;;  %v769_v16 = vld [vmem:[%s1272_s0 + $0x10] sm:$0xff] }
   0xf   :  { %v775_v9 = vld [vmem:[%s1272_s0 + $0x40] sm:$0xff]  ;;  %v776_v13 = vld [vmem:[%s1272_s0 + $0x48] sm:$0xff]  ;;  %v777_v17 = vld [vmem:[%s1272_s0 + $0x50] sm:$0xff] }
  0x10   :  { %369 = vmatpush.bf16.msra.mxu0 %v805_v1  ;;  %810 = vmatpush.bf16.msra.mxu1 %v805_v1  ;;  %v783_v10 = vld [vmem:[%s1272_s0 + $0x80] sm:$0xff]  ;;  %v784_v14 = vld [vmem:[%s1272_s0 + $0x88] sm:$0xff]  ;;  %v785_v18 = vld [vmem:[%s1272_s0 + $0x90] sm:$0xff] }
  0x11   :  { %811 = vmatpush.bf16.msra.mxu2 %v805_v1  ;;  %812 = vmatpush.bf16.msra.mxu3 %v805_v1  ;;  %v791_v11 = vld [vmem:[%s1272_s0 + $0xc0] sm:$0xff]  ;;  %v792_v15 = vld [vmem:[%s1272_s0 + $0xc8] sm:$0xff]  ;;  %v793_v19 = vld [vmem:[%s1272_s0 + $0xd0] sm:$0xff] }
  0x12   :  { %v770_v20 = vld [vmem:[%s1272_s0 + $0x18] sm:$0xff]  ;;  %v771_v24 = vld [vmem:[%s1272_s0 + $0x20] sm:$0xff]  ;;  %v772_v28 = vld [vmem:[%s1272_s0 + $0x28] sm:$0xff] }
  0x13   :  { %v778_v21 = vld [vmem:[%s1272_s0 + $0x58] sm:$0xff]  ;;  %v779_v25 = vld [vmem:[%s1272_s0 + $0x60] sm:$0xff]  ;;  %v780_v29 = vld [vmem:[%s1272_s0 + $0x68] sm:$0xff] }
  0x14   :  { %370 = vmatpush.bf16.msra.mxu0 %v804_v2  ;;  %813 = vmatpush.bf16.msra.mxu1 %v804_v2  ;;  %v786_v22 = vld [vmem:[%s1272_s0 + $0x98] sm:$0xff]  ;;  %v787_v26 = vld [vmem:[%s1272_s0 + $0xa0] sm:$0xff]  ;;  %v788_v30 = vld [vmem:[%s1272_s0 + $0xa8] sm:$0xff] }
  0x15   :  { %814 = vmatpush.bf16.msra.mxu2 %v804_v2  ;;  %815 = vmatpush.bf16.msra.mxu3 %v804_v2  ;;  %v794_v23 = vld [vmem:[%s1272_s0 + $0xd8] sm:$0xff]  ;;  %v795_v27 = vld [vmem:[%s1272_s0 + $0xe0] sm:$0xff]  ;;  %v796_v31 = vld [vmem:[%s1272_s0 + $0xe8] sm:$0xff] }
  0x16   :  { %v773_v32 = vld [vmem:[%s1272_s0 + $0x30] sm:$0xff]  ;;  %v774_v36 = vld [vmem:[%s1272_s0 + $0x38] sm:$0xff]  ;;  %v1014_v40 = vld [vmem:[#allocation4] ss:$0 sm:$0xff] }
  0x17   :  { %v781_v33 = vld [vmem:[%s1272_s0 + $0x70] sm:$0xff]  ;;  %v782_v37 = vld [vmem:[%s1272_s0 + $0x78] sm:$0xff] }
  0x18   :  { %371 = vmatpush.bf16.msra.mxu0 %v803_v3  ;;  %816 = vmatpush.bf16.msra.mxu1 %v803_v3  ;;  %v789_v34 = vld [vmem:[%s1272_s0 + $0xb0] sm:$0xff]  ;;  %v790_v38 = vld [vmem:[%s1272_s0 + $0xb8] sm:$0xff] }
  0x19   :  { %817 = vmatpush.bf16.msra.mxu2 %v803_v3  ;;  %818 = vmatpush.bf16.msra.mxu3 %v803_v3  ;;  %v797_v35 = vld [vmem:[%s1272_s0 + $0xf0] sm:$0xff]  ;;  %v798_v39 = vld [vmem:[%s1272_s0 + $0xf8] sm:$0xff] }
  0x1c   :  { %372 = vmatpush.bf16.msra.mxu0 %v802_v4  ;;  %819 = vmatpush.bf16.msra.mxu1 %v802_v4 }
  0x1d   :  { %820 = vmatpush.bf16.msra.mxu2 %v802_v4  ;;  %821 = vmatpush.bf16.msra.mxu3 %v802_v4 }
  0x20   :  { %373 = vmatpush.bf16.msra.mxu0 %v801_v5  ;;  %822 = vmatpush.bf16.msra.mxu1 %v801_v5 }
  0x21   :  { %823 = vmatpush.bf16.msra.mxu2 %v801_v5  ;;  %824 = vmatpush.bf16.msra.mxu3 %v801_v5 }
  0x24   :  { %374 = vmatpush.bf16.msra.mxu0 %v800_v6  ;;  %825 = vmatpush.bf16.msra.mxu1 %v800_v6 }
  0x25   :  { %826 = vmatpush.bf16.msra.mxu2 %v800_v6  ;;  %827 = vmatpush.bf16.msra.mxu3 %v800_v6 }
  0x28   :  { %375 = vmatpush.bf16.msra.mxu0 %v799_v7  ;;  %828 = vmatpush.bf16.msra.mxu1 %v799_v7 }
  0x29   :  { %829 = vmatpush.bf16.msra.mxu2 %v799_v7  ;;  %830 = vmatpush.bf16.msra.mxu3 %v799_v7 }
  0x2b   :  { %376 = vmatmul.bf16.vlgmr.msra.gmra.mxu0 %v767_v8  ;;  %416 = vmatmul.bf16.vlgmr.msra.gmra.mxu1 %v775_v9 }
  0x2c   :  { %456 = vmatmul.bf16.vlgmr.msra.gmra.mxu2 %v783_v10  ;;  %496 = vmatmul.bf16.vlgmr.msra.gmra.mxu3 %v791_v11 }
  0x3b   :  { %381 = vmatmul.bf16.gmra.mxu0 %v768_v12  ;;  %421 = vmatmul.bf16.gmra.mxu1 %v776_v13 }
  0x3c   :  { %461 = vmatmul.bf16.gmra.mxu2 %v784_v14  ;;  %501 = vmatmul.bf16.gmra.mxu3 %v792_v15 }
  0x4b   :  { %386 = vmatmul.bf16.gmra.mxu0 %v769_v16  ;;  %426 = vmatmul.bf16.gmra.mxu1 %v777_v17 }
  0x4c   :  { %466 = vmatmul.bf16.gmra.mxu2 %v785_v18  ;;  %506 = vmatmul.bf16.gmra.mxu3 %v793_v19 }
  0x5b   :  { %391 = vmatmul.bf16.gmra.mxu0 %v770_v20  ;;  %431 = vmatmul.bf16.gmra.mxu1 %v778_v21 }
  0x5c   :  { %471 = vmatmul.bf16.gmra.mxu2 %v786_v22  ;;  %511 = vmatmul.bf16.gmra.mxu3 %v794_v23 }
  0x6b   :  { %396 = vmatmul.bf16.gmra.mxu0 %v771_v24  ;;  %436 = vmatmul.bf16.gmra.mxu1 %v779_v25 }
  0x6c   :  { %476 = vmatmul.bf16.gmra.mxu2 %v787_v26  ;;  %516 = vmatmul.bf16.gmra.mxu3 %v795_v27 }
  0x7b   :  { %401 = vmatmul.bf16.gmra.mxu0 %v772_v28  ;;  %441 = vmatmul.bf16.gmra.mxu1 %v780_v29 }
  0x7c   :  { %481 = vmatmul.bf16.gmra.mxu2 %v788_v30  ;;  %521 = vmatmul.bf16.gmra.mxu3 %v796_v31 }
  0x8b   :  { %406 = vmatmul.bf16.gmra.mxu0 %v773_v32  ;;  %446 = vmatmul.bf16.gmra.mxu1 %v781_v33 }
  0x8c   :  { %486 = vmatmul.bf16.gmra.mxu2 %v789_v34  ;;  %526 = vmatmul.bf16.gmra.mxu3 %v797_v35 }
  0x9b   :  { %411 = vmatmul.bf16.gmra.mxu0 %v774_v36  ;;  %451 = vmatmul.bf16.gmra.mxu1 %v782_v37 }
  0x9c   :  { %491 = vmatmul.bf16.gmra.mxu2 %v790_v38  ;;  %531 = vmatmul.bf16.gmra.mxu3 %v798_v39 }
  0xa8   :  { %v377_v41 = vpop.f32.mrf.mxu0  ;;  %v417_v42 = vpop.f32.mrf.mxu1 }
  0xa9   :  { %v378_v43 = vadd.f32 %v1014_v40, %v377_v41  ;;  %v418_v44 = vadd.f32 %v1014_v40, %v417_v42 }
  0xab   :  { %537 = vst [vmem:[%s1275_s3] sm:$0xff] %v378_v43 }
  0xac   :  { %553 = vst [vmem:[%s1275_s3 + $0x80] sm:$0xff] %v418_v44 }
  0xaf   :  { %v457_v45 = vpop.f32.mrf.mxu2  ;;  %v497_v46 = vpop.f32.mrf.mxu3 }
  0xb0   :  { %v458_v47 = vadd.f32 %v1014_v40, %v457_v45  ;;  %v498_v48 = vadd.f32 %v1014_v40, %v497_v46  ;;  %v379_v49 = vpop.f32.mrf.mxu0  ;;  %v419_v50 = vpop.f32.mrf.mxu1 }
  0xb1   :  { %v380_v51 = vadd.f32 %v1014_v40, %v379_v49  ;;  %v420_v52 = vadd.f32 %v1014_v40, %v419_v50 }
  0xb2   :  { %569 = vst [vmem:[%s1275_s3 + $0x100] sm:$0xff] %v458_v47 }
  0xb3   :  { %585 = vst [vmem:[%s1275_s3 + $0x180] sm:$0xff] %v498_v48 }
  0xb4   :  { %538 = vst [vmem:[%s1275_s3 + $0x8] sm:$0xff] %v380_v51 }
  0xb5   :  { %554 = vst [vmem:[%s1275_s3 + $0x88] sm:$0xff] %v420_v52 }
  0xb7   :  { %v459_v53 = vpop.f32.mrf.mxu2  ;;  %v499_v54 = vpop.f32.mrf.mxu3 }
  0xb8   :  { %v460_v55 = vadd.f32 %v1014_v40, %v459_v53  ;;  %v500_v56 = vadd.f32 %v1014_v40, %v499_v54  ;;  %v382_v57 = vpop.f32.mrf.mxu0  ;;  %v422_v58 = vpop.f32.mrf.mxu1 }
  0xb9   :  { %v383_v59 = vadd.f32 %v1014_v40, %v382_v57  ;;  %v423_v60 = vadd.f32 %v1014_v40, %v422_v58 }
  0xba   :  { %570 = vst [vmem:[%s1275_s3 + $0x108] sm:$0xff] %v460_v55 }
  0xbb   :  { %586 = vst [vmem:[%s1275_s3 + $0x188] sm:$0xff] %v500_v56 }
  0xbc   :  { %539 = vst [vmem:[%s1275_s3 + $0x10] sm:$0xff] %v383_v59 }
  0xbd   :  { %555 = vst [vmem:[%s1275_s3 + $0x90] sm:$0xff] %v423_v60 }
  0xbf   :  { %v462_v61 = vpop.f32.mrf.mxu2  ;;  %v502_v62 = vpop.f32.mrf.mxu3 }
  0xc0   :  { %v463_v63 = vadd.f32 %v1014_v40, %v462_v61  ;;  %v503_v0 = vadd.f32 %v1014_v40, %v502_v62  ;;  %v384_v1 = vpop.f32.mrf.mxu0  ;;  %v424_v2 = vpop.f32.mrf.mxu1 }
  0xc1   :  { %v385_v3 = vadd.f32 %v1014_v40, %v384_v1  ;;  %v425_v4 = vadd.f32 %v1014_v40, %v424_v2 }
  0xc2   :  { %571 = vst [vmem:[%s1275_s3 + $0x110] sm:$0xff] %v463_v63 }
  0xc3   :  { %587 = vst [vmem:[%s1275_s3 + $0x190] sm:$0xff] %v503_v0 }
  0xc4   :  { %540 = vst [vmem:[%s1275_s3 + $0x18] sm:$0xff] %v385_v3 }
  0xc5   :  { %556 = vst [vmem:[%s1275_s3 + $0x98] sm:$0xff] %v425_v4 }
  0xc7   :  { %v464_v5 = vpop.f32.mrf.mxu2  ;;  %v504_v6 = vpop.f32.mrf.mxu3 }
  0xc8   :  { %v465_v7 = vadd.f32 %v1014_v40, %v464_v5  ;;  %v505_v8 = vadd.f32 %v1014_v40, %v504_v6  ;;  %v387_v9 = vpop.f32.mrf.mxu0  ;;  %v427_v10 = vpop.f32.mrf.mxu1 }
  0xc9   :  { %v388_v11 = vadd.f32 %v1014_v40, %v387_v9  ;;  %v428_v12 = vadd.f32 %v1014_v40, %v427_v10 }
  0xca   :  { %572 = vst [vmem:[%s1275_s3 + $0x118] sm:$0xff] %v465_v7 }
  0xcb   :  { %588 = vst [vmem:[%s1275_s3 + $0x198] sm:$0xff] %v505_v8 }
  0xcc   :  { %541 = vst [vmem:[%s1275_s3 + $0x20] sm:$0xff] %v388_v11 }
  0xcd   :  { %557 = vst [vmem:[%s1275_s3 + $0xa0] sm:$0xff] %v428_v12 }
  0xcf   :  { %v467_v13 = vpop.f32.mrf.mxu2  ;;  %v507_v14 = vpop.f32.mrf.mxu3 }
  0xd0   :  { %v468_v15 = vadd.f32 %v1014_v40, %v467_v13  ;;  %v508_v16 = vadd.f32 %v1014_v40, %v507_v14  ;;  %v389_v17 = vpop.f32.mrf.mxu0  ;;  %v429_v18 = vpop.f32.mrf.mxu1 }
  0xd1   :  { %v390_v19 = vadd.f32 %v1014_v40, %v389_v17  ;;  %v430_v20 = vadd.f32 %v1014_v40, %v429_v18 }
  0xd2   :  { %573 = vst [vmem:[%s1275_s3 + $0x120] sm:$0xff] %v468_v15 }
  0xd3   :  { %589 = vst [vmem:[%s1275_s3 + $0x1a0] sm:$0xff] %v508_v16 }
  0xd4   :  { %542 = vst [vmem:[%s1275_s3 + $0x28] sm:$0xff] %v390_v19 }
  0xd5   :  { %558 = vst [vmem:[%s1275_s3 + $0xa8] sm:$0xff] %v430_v20 }
  0xd7   :  { %v469_v21 = vpop.f32.mrf.mxu2  ;;  %v509_v22 = vpop.f32.mrf.mxu3 }
  0xd8   :  { %v470_v23 = vadd.f32 %v1014_v40, %v469_v21  ;;  %v510_v24 = vadd.f32 %v1014_v40, %v509_v22  ;;  %v392_v25 = vpop.f32.mrf.mxu0  ;;  %v432_v26 = vpop.f32.mrf.mxu1 }
  0xd9   :  { %v393_v27 = vadd.f32 %v1014_v40, %v392_v25  ;;  %v433_v28 = vadd.f32 %v1014_v40, %v432_v26 }
  0xda   :  { %574 = vst [vmem:[%s1275_s3 + $0x128] sm:$0xff] %v470_v23 }
  0xdb   :  { %590 = vst [vmem:[%s1275_s3 + $0x1a8] sm:$0xff] %v510_v24 }
  0xdc   :  { %543 = vst [vmem:[%s1275_s3 + $0x30] sm:$0xff] %v393_v27 }
  0xdd   :  { %559 = vst [vmem:[%s1275_s3 + $0xb0] sm:$0xff] %v433_v28 }
  0xdf   :  { %v472_v29 = vpop.f32.mrf.mxu2  ;;  %v512_v30 = vpop.f32.mrf.mxu3 }
  0xe0   :  { %v473_v31 = vadd.f32 %v1014_v40, %v472_v29  ;;  %v513_v32 = vadd.f32 %v1014_v40, %v512_v30  ;;  %v394_v33 = vpop.f32.mrf.mxu0  ;;  %v434_v34 = vpop.f32.mrf.mxu1 }
  0xe1   :  { %v395_v35 = vadd.f32 %v1014_v40, %v394_v33  ;;  %v435_v36 = vadd.f32 %v1014_v40, %v434_v34 }
  0xe2   :  { %575 = vst [vmem:[%s1275_s3 + $0x130] sm:$0xff] %v473_v31 }
  0xe3   :  { %591 = vst [vmem:[%s1275_s3 + $0x1b0] sm:$0xff] %v513_v32 }
  0xe4   :  { %544 = vst [vmem:[%s1275_s3 + $0x38] sm:$0xff] %v395_v35 }
  0xe5   :  { %560 = vst [vmem:[%s1275_s3 + $0xb8] sm:$0xff] %v435_v36 }
  0xe7   :  { %v474_v37 = vpop.f32.mrf.mxu2  ;;  %v514_v38 = vpop.f32.mrf.mxu3 }
  0xe8   :  { %v475_v39 = vadd.f32 %v1014_v40, %v474_v37  ;;  %v515_v41 = vadd.f32 %v1014_v40, %v514_v38  ;;  %v397_v42 = vpop.f32.mrf.mxu0  ;;  %v437_v43 = vpop.f32.mrf.mxu1 }
  0xe9   :  { %v398_v44 = vadd.f32 %v1014_v40, %v397_v42  ;;  %v438_v45 = vadd.f32 %v1014_v40, %v437_v43 }
  0xea   :  { %576 = vst [vmem:[%s1275_s3 + $0x138] sm:$0xff] %v475_v39 }
  0xeb   :  { %592 = vst [vmem:[%s1275_s3 + $0x1b8] sm:$0xff] %v515_v41 }
  0xec   :  { %545 = vst [vmem:[%s1275_s3 + $0x40] sm:$0xff] %v398_v44 }
  0xed   :  { %561 = vst [vmem:[%s1275_s3 + $0xc0] sm:$0xff] %v438_v45 }
  0xef   :  { %v477_v46 = vpop.f32.mrf.mxu2  ;;  %v517_v47 = vpop.f32.mrf.mxu3 }
  0xf0   :  { %v478_v48 = vadd.f32 %v1014_v40, %v477_v46  ;;  %v518_v49 = vadd.f32 %v1014_v40, %v517_v47  ;;  %v399_v50 = vpop.f32.mrf.mxu0  ;;  %v439_v51 = vpop.f32.mrf.mxu1 }
  0xf1   :  { %v400_v52 = vadd.f32 %v1014_v40, %v399_v50  ;;  %v440_v53 = vadd.f32 %v1014_v40, %v439_v51 }
  0xf2   :  { %577 = vst [vmem:[%s1275_s3 + $0x140] sm:$0xff] %v478_v48 }
  0xf3   :  { %593 = vst [vmem:[%s1275_s3 + $0x1c0] sm:$0xff] %v518_v49 }
  0xf4   :  { %546 = vst [vmem:[%s1275_s3 + $0x48] sm:$0xff] %v400_v52 }
  0xf5   :  { %562 = vst [vmem:[%s1275_s3 + $0xc8] sm:$0xff] %v440_v53 }
  0xf7   :  { %v479_v54 = vpop.f32.mrf.mxu2  ;;  %v519_v55 = vpop.f32.mrf.mxu3 }
  0xf8   :  { %v480_v56 = vadd.f32 %v1014_v40, %v479_v54  ;;  %v520_v57 = vadd.f32 %v1014_v40, %v519_v55  ;;  %v402_v58 = vpop.f32.mrf.mxu0  ;;  %v442_v59 = vpop.f32.mrf.mxu1 }
  0xf9   :  { %v403_v60 = vadd.f32 %v1014_v40, %v402_v58  ;;  %v443_v61 = vadd.f32 %v1014_v40, %v442_v59 }
  0xfa   :  { %578 = vst [vmem:[%s1275_s3 + $0x148] sm:$0xff] %v480_v56 }
  0xfb   :  { %594 = vst [vmem:[%s1275_s3 + $0x1c8] sm:$0xff] %v520_v57 }
  0xfc   :  { %547 = vst [vmem:[%s1275_s3 + $0x50] sm:$0xff] %v403_v60 }
  0xfd   :  { %563 = vst [vmem:[%s1275_s3 + $0xd0] sm:$0xff] %v443_v61 }
  0xff   :  { %v482_v62 = vpop.f32.mrf.mxu2  ;;  %v522_v63 = vpop.f32.mrf.mxu3 }
 0x100   :  { %v483_v0 = vadd.f32 %v1014_v40, %v482_v62  ;;  %v523_v1 = vadd.f32 %v1014_v40, %v522_v63  ;;  %v404_v2 = vpop.f32.mrf.mxu0  ;;  %v444_v3 = vpop.f32.mrf.mxu1 }
 0x101   :  { %v405_v4 = vadd.f32 %v1014_v40, %v404_v2  ;;  %v445_v5 = vadd.f32 %v1014_v40, %v444_v3 }
 0x102   :  { %579 = vst [vmem:[%s1275_s3 + $0x150] sm:$0xff] %v483_v0 }
 0x103   :  { %595 = vst [vmem:[%s1275_s3 + $0x1d0] sm:$0xff] %v523_v1 }
 0x104   :  { %548 = vst [vmem:[%s1275_s3 + $0x58] sm:$0xff] %v405_v4 }
 0x105   :  { %564 = vst [vmem:[%s1275_s3 + $0xd8] sm:$0xff] %v445_v5 }
 0x107   :  { %v484_v6 = vpop.f32.mrf.mxu2  ;;  %v524_v7 = vpop.f32.mrf.mxu3 }
 0x108   :  { %v485_v8 = vadd.f32 %v1014_v40, %v484_v6  ;;  %v525_v9 = vadd.f32 %v1014_v40, %v524_v7  ;;  %v407_v10 = vpop.f32.mrf.mxu0  ;;  %v447_v11 = vpop.f32.mrf.mxu1 }
 0x109   :  { %v408_v12 = vadd.f32 %v1014_v40, %v407_v10  ;;  %v448_v13 = vadd.f32 %v1014_v40, %v447_v11 }
 0x10a   :  { %580 = vst [vmem:[%s1275_s3 + $0x158] sm:$0xff] %v485_v8 }
 0x10b   :  { %596 = vst [vmem:[%s1275_s3 + $0x1d8] sm:$0xff] %v525_v9 }
 0x10c   :  { %549 = vst [vmem:[%s1275_s3 + $0x60] sm:$0xff] %v408_v12 }
 0x10d   :  { %565 = vst [vmem:[%s1275_s3 + $0xe0] sm:$0xff] %v448_v13 }
 0x10f   :  { %v487_v14 = vpop.f32.mrf.mxu2  ;;  %v527_v15 = vpop.f32.mrf.mxu3 }
 0x110   :  { %v488_v16 = vadd.f32 %v1014_v40, %v487_v14  ;;  %v528_v17 = vadd.f32 %v1014_v40, %v527_v15  ;;  %v409_v18 = vpop.f32.mrf.mxu0  ;;  %v449_v19 = vpop.f32.mrf.mxu1 }
 0x111   :  { %v410_v20 = vadd.f32 %v1014_v40, %v409_v18  ;;  %v450_v21 = vadd.f32 %v1014_v40, %v449_v19 }
 0x112   :  { %581 = vst [vmem:[%s1275_s3 + $0x160] sm:$0xff] %v488_v16 }
 0x113   :  { %597 = vst [vmem:[%s1275_s3 + $0x1e0] sm:$0xff] %v528_v17 }
 0x114   :  { %550 = vst [vmem:[%s1275_s3 + $0x68] sm:$0xff] %v410_v20 }
 0x115   :  { %566 = vst [vmem:[%s1275_s3 + $0xe8] sm:$0xff] %v450_v21 }
 0x117   :  { %v489_v22 = vpop.f32.mrf.mxu2  ;;  %v529_v23 = vpop.f32.mrf.mxu3 }
 0x118   :  { %v490_v24 = vadd.f32 %v1014_v40, %v489_v22  ;;  %v530_v25 = vadd.f32 %v1014_v40, %v529_v23  ;;  %v412_v26 = vpop.f32.mrf.mxu0  ;;  %v452_v27 = vpop.f32.mrf.mxu1 }
 0x119   :  { %v413_v28 = vadd.f32 %v1014_v40, %v412_v26  ;;  %v453_v29 = vadd.f32 %v1014_v40, %v452_v27 }
 0x11a   :  { %582 = vst [vmem:[%s1275_s3 + $0x168] sm:$0xff] %v490_v24 }
 0x11b   :  { %598 = vst [vmem:[%s1275_s3 + $0x1e8] sm:$0xff] %v530_v25 }
 0x11c   :  { %551 = vst [vmem:[%s1275_s3 + $0x70] sm:$0xff] %v413_v28 }
 0x11d   :  { %567 = vst [vmem:[%s1275_s3 + $0xf0] sm:$0xff] %v453_v29 }
 0x11f   :  { %v492_v30 = vpop.f32.mrf.mxu2  ;;  %v532_v31 = vpop.f32.mrf.mxu3 }
 0x120   :  { %v493_v32 = vadd.f32 %v1014_v40, %v492_v30  ;;  %v533_v33 = vadd.f32 %v1014_v40, %v532_v31  ;;  %v414_v34 = vpop.f32.mrf.mxu0  ;;  %v454_v35 = vpop.f32.mrf.mxu1 }
 0x121   :  { %v415_v36 = vadd.f32 %v1014_v40, %v414_v34  ;;  %v455_v37 = vadd.f32 %v1014_v40, %v454_v35 }
 0x122   :  { %583 = vst [vmem:[%s1275_s3 + $0x170] sm:$0xff] %v493_v32 }
 0x123   :  { %599 = vst [vmem:[%s1275_s3 + $0x1f0] sm:$0xff] %v533_v33 }
 0x124   :  { %552 = vst [vmem:[%s1275_s3 + $0x78] sm:$0xff] %v415_v36 }
 0x125   :  { %568 = vst [vmem:[%s1275_s3 + $0xf8] sm:$0xff] %v455_v37 }
 0x127   :  { %v494_v38 = vpop.f32.mrf.mxu2  ;;  %v534_v39 = vpop.f32.mrf.mxu3 }
 0x128   :  { %v495_v41 = vadd.f32 %v1014_v40, %v494_v38  ;;  %v535_v42 = vadd.f32 %v1014_v40, %v534_v39 }
 0x12a   :  { %584 = vst [vmem:[%s1275_s3 + $0x178] sm:$0xff] %v495_v41 }
 0x12b   :  { %600 = vst [vmem:[%s1275_s3 + $0x1f8] sm:$0xff] %v535_v42 }
 0x12c   :  { %605 = vsyncpa [#allocation3], 1 }
 0x12d   :  { %606 = vsyncpa [#allocation5], 1 }

// kernel: gf_forward.16
= control target key start
LH: loop header
LB: loop body
LE: loop exit
PB: predicated region body
PF: predicated region fallthrough
CT: control target
= control target key end

     0   :  { %s195_s1 = inlined_call_operand.vmem [shape: bf16[128,128], index: 1, kind: input, shape index: {}]   ;;  %s196_s2 = inlined_call_operand.vmem [shape: f32[1,128], index: 2, kind: input, shape index: {}]   ;;  %s197_s0 = inlined_call_operand.vmem [shape: bf16[8,128], index: 0, kind: input, shape index: {}]   ;;  %s198_s3 = inlined_call_operand.vmem [shape: f32[8,128], index: 3, kind: output, shape index: {}]  }
   0x1   :  { %v140_v0 = vld [vmem:[%s195_s1 + $0x38] sm:$0xff]  ;;  %v139_v1 = vld [vmem:[%s195_s1 + $0x30] sm:$0xff]  ;;  %v138_v2 = vld [vmem:[%s195_s1 + $0x28] sm:$0xff] }
   0x2   :  { %83 = vmatpush.bf16.msra.mxu0 %v140_v0  ;;  %v137_v3 = vld [vmem:[%s195_s1 + $0x20] sm:$0xff]  ;;  %v136_v4 = vld [vmem:[%s195_s1 + $0x18] sm:$0xff]  ;;  %v135_v5 = vld [vmem:[%s195_s1 + $0x10] sm:$0xff] }
   0x3   :  { %v134_v6 = vld [vmem:[%s195_s1 + $0x8] sm:$0xff]  ;;  %v133_v7 = vld [vmem:[%s195_s1] sm:$0xff] }
   0x4   :  { %v14_v8 = vld [vmem:[%s197_s0] sm:$0xf] }
   0x5   :  { %v141_v9 = vld [vmem:[%s196_s2] ss:$0 sm:$0xff] }
   0x6   :  { %84 = vmatpush.bf16.msra.mxu0 %v139_v1 }
   0xa   :  { %85 = vmatpush.bf16.msra.mxu0 %v138_v2 }
   0xe   :  { %86 = vmatpush.bf16.msra.mxu0 %v137_v3 }
  0x12   :  { %87 = vmatpush.bf16.msra.mxu0 %v136_v4 }
  0x16   :  { %88 = vmatpush.bf16.msra.mxu0 %v135_v5 }
  0x1a   :  { %89 = vmatpush.bf16.msra.mxu0 %v134_v6 }
  0x1e   :  { %90 = vmatpush.bf16.msra.mxu0 %v133_v7 }
  0x21   :  { %91 = vmatmul.bf16.vlgmr.msra.gmra.mxu0 %v14_v8 }
  0x9e   :  { %v92_v10 = vpop.f32.mrf.mxu0 }
  0x9f   :  { %v93_v11 = vadd.f32 %v141_v9, %v92_v10 }
  0xa1   :  { %96 = vst [vmem:[%s198_s3] sm:$0xff] %v93_v11 }
  0xa6   :  { %v94_v12 = vpop.f32.mrf.mxu0 }

// kernel: gf_forward.17
= control target key start
LH: loop header
LB: loop body
LE: loop exit
PB: predicated region body
PF: predicated region fallthrough
CT: control target
= control target key end

     0   :  { %s439_s1 = inlined_call_operand.vmem [shape: bf16[128,128], index: 1, kind: input, shape index: {}]   ;;  %s440_s2 = inlined_call_operand.vmem [shape: f32[1,128], index: 2, kind: input, shape index: {}]   ;;  %s441_s0 = inlined_call_operand.vmem [shape: bf16[128,128], index: 0, kind: input, shape index: {}]   ;;  %s442_s3 = inlined_call_operand.vmem [shape: f32[128,128], index: 3, kind: output, shape index: {}]  }
   0x1   :  { %v294_v0 = vld [vmem:[%s439_s1 + $0x38] sm:$0xff]  ;;  %v293_v1 = vld [vmem:[%s439_s1 + $0x30] sm:$0xff]  ;;  %v292_v2 = vld [vmem:[%s439_s1 + $0x28] sm:$0xff] }
   0x2   :  { %146 = vmatpush.bf16.msra.mxu0 %v294_v0  ;;  %295 = vmatpush.bf16.msra.mxu1 %v294_v0  ;;  %v291_v3 = vld [vmem:[%s439_s1 + $0x20] sm:$0xff]  ;;  %v290_v4 = vld [vmem:[%s439_s1 + $0x18] sm:$0xff]  ;;  %v289_v5 = vld [vmem:[%s439_s1 + $0x10] sm:$0xff] }
   0x3   :  { %296 = vmatpush.bf16.msra.mxu2 %v294_v0  ;;  %297 = vmatpush.bf16.msra.mxu3 %v294_v0  ;;  %v288_v6 = vld [vmem:[%s439_s1 + $0x8] sm:$0xff]  ;;  %v287_v7 = vld [vmem:[%s439_s1] sm:$0xff]  ;;  %v281_v9 = vld [vmem:[%s441_s0 + $0x10] sm:$0xff] }
   0x4   :  { %v279_v8 = vld [vmem:[%s441_s0] sm:$0xff]  ;;  %v285_v11 = vld [vmem:[%s441_s0 + $0x30] sm:$0xff]  ;;  %v280_v12 = vld [vmem:[%s441_s0 + $0x8] sm:$0xff] }
   0x5   :  { %v283_v10 = vld [vmem:[%s441_s0 + $0x20] sm:$0xff]  ;;  %v282_v13 = vld [vmem:[%s441_s0 + $0x18] sm:$0xff]  ;;  %v284_v14 = vld [vmem:[%s441_s0 + $0x28] sm:$0xff] }
   0x6   :  { %147 = vmatpush.bf16.msra.mxu0 %v293_v1  ;;  %298 = vmatpush.bf16.msra.mxu1 %v293_v1  ;;  %v286_v15 = vld [vmem:[%s441_s0 + $0x38] sm:$0xff]  ;;  %v319_v16 = vld [vmem:[%s440_s2] ss:$0 sm:$0xff] }
   0x7   :  { %299 = vmatpush.bf16.msra.mxu2 %v293_v1  ;;  %300 = vmatpush.bf16.msra.mxu3 %v293_v1 }
   0xa   :  { %148 = vmatpush.bf16.msra.mxu0 %v292_v2  ;;  %301 = vmatpush.bf16.msra.mxu1 %v292_v2 }
   0xb   :  { %302 = vmatpush.bf16.msra.mxu2 %v292_v2  ;;  %303 = vmatpush.bf16.msra.mxu3 %v292_v2 }
   0xe   :  { %149 = vmatpush.bf16.msra.mxu0 %v291_v3  ;;  %304 = vmatpush.bf16.msra.mxu1 %v291_v3 }
   0xf   :  { %305 = vmatpush.bf16.msra.mxu2 %v291_v3  ;;  %306 = vmatpush.bf16.msra.mxu3 %v291_v3 }
  0x12   :  { %150 = vmatpush.bf16.msra.mxu0 %v290_v4  ;;  %307 = vmatpush.bf16.msra.mxu1 %v290_v4 }
  0x13   :  { %308 = vmatpush.bf16.msra.mxu2 %v290_v4  ;;  %309 = vmatpush.bf16.msra.mxu3 %v290_v4 }
  0x16   :  { %151 = vmatpush.bf16.msra.mxu0 %v289_v5  ;;  %310 = vmatpush.bf16.msra.mxu1 %v289_v5 }
  0x17   :  { %311 = vmatpush.bf16.msra.mxu2 %v289_v5  ;;  %312 = vmatpush.bf16.msra.mxu3 %v289_v5 }
  0x1a   :  { %152 = vmatpush.bf16.msra.mxu0 %v288_v6  ;;  %313 = vmatpush.bf16.msra.mxu1 %v288_v6 }
  0x1b   :  { %314 = vmatpush.bf16.msra.mxu2 %v288_v6  ;;  %315 = vmatpush.bf16.msra.mxu3 %v288_v6 }
  0x1e   :  { %153 = vmatpush.bf16.msra.mxu0 %v287_v7  ;;  %316 = vmatpush.bf16.msra.mxu1 %v287_v7 }
  0x1f   :  { %317 = vmatpush.bf16.msra.mxu2 %v287_v7  ;;  %318 = vmatpush.bf16.msra.mxu3 %v287_v7 }
  0x21   :  { %154 = vmatmul.bf16.vlgmr.msra.gmra.mxu0 %v279_v8  ;;  %164 = vmatmul.bf16.vlgmr.msra.gmra.mxu1 %v281_v9 }
  0x22   :  { %174 = vmatmul.bf16.vlgmr.msra.gmra.mxu2 %v283_v10  ;;  %184 = vmatmul.bf16.vlgmr.msra.gmra.mxu3 %v285_v11 }
  0x31   :  { %159 = vmatmul.bf16.gmra.mxu0 %v280_v12  ;;  %169 = vmatmul.bf16.gmra.mxu1 %v282_v13 }
  0x32   :  { %179 = vmatmul.bf16.gmra.mxu2 %v284_v14  ;;  %189 = vmatmul.bf16.gmra.mxu3 %v286_v15 }
  0x9e   :  { %v155_v17 = vpop.f32.mrf.mxu0  ;;  %v165_v18 = vpop.f32.mrf.mxu1 }
  0x9f   :  { %v156_v19 = vadd.f32 %v319_v16, %v155_v17  ;;  %v166_v20 = vadd.f32 %v319_v16, %v165_v18 }
  0xa1   :  { %195 = vst [vmem:[%s442_s3] sm:$0xff] %v156_v19 }
  0xa2   :  { %199 = vst [vmem:[%s442_s3 + $0x20] sm:$0xff] %v166_v20 }
  0xa5   :  { %v175_v21 = vpop.f32.mrf.mxu2  ;;  %v185_v22 = vpop.f32.mrf.mxu3 }
  0xa6   :  { %v176_v23 = vadd.f32 %v319_v16, %v175_v21  ;;  %v186_v24 = vadd.f32 %v319_v16, %v185_v22  ;;  %v157_v25 = vpop.f32.mrf.mxu0  ;;  %v167_v26 = vpop.f32.mrf.mxu1 }
  0xa7   :  { %v158_v27 = vadd.f32 %v319_v16, %v157_v25  ;;  %v168_v28 = vadd.f32 %v319_v16, %v167_v26 }
  0xa8   :  { %203 = vst [vmem:[%s442_s3 + $0x40] sm:$0xff] %v176_v23 }
  0xa9   :  { %207 = vst [vmem:[%s442_s3 + $0x60] sm:$0xff] %v186_v24 }
  0xaa   :  { %196 = vst [vmem:[%s442_s3 + $0x8] sm:$0xff] %v158_v27 }
  0xab   :  { %200 = vst [vmem:[%s442_s3 + $0x28] sm:$0xff] %v168_v28 }
  0xad   :  { %v177_v29 = vpop.f32.mrf.mxu2  ;;  %v187_v30 = vpop.f32.mrf.mxu3 }
  0xae   :  { %v178_v31 = vadd.f32 %v319_v16, %v177_v29  ;;  %v188_v32 = vadd.f32 %v319_v16, %v187_v30  ;;  %v160_v33 = vpop.f32.mrf.mxu0  ;;  %v170_v34 = vpop.f32.mrf.mxu1 }
  0xaf   :  { %v161_v35 = vadd.f32 %v319_v16, %v160_v33  ;;  %v171_v36 = vadd.f32 %v319_v16, %v170_v34 }
  0xb0   :  { %204 = vst [vmem:[%s442_s3 + $0x48] sm:$0xff] %v178_v31 }
  0xb1   :  { %208 = vst [vmem:[%s442_s3 + $0x68] sm:$0xff] %v188_v32 }
  0xb2   :  { %197 = vst [vmem:[%s442_s3 + $0x10] sm:$0xff] %v161_v35 }
  0xb3   :  { %201 = vst [vmem:[%s442_s3 + $0x30] sm:$0xff] %v171_v36 }
  0xb5   :  { %v180_v37 = vpop.f32.mrf.mxu2  ;;  %v190_v38 = vpop.f32.mrf.mxu3 }
  0xb6   :  { %v181_v39 = vadd.f32 %v319_v16, %v180_v37  ;;  %v191_v40 = vadd.f32 %v319_v16, %v190_v38  ;;  %v162_v41 = vpop.f32.mrf.mxu0  ;;  %v172_v42 = vpop.f32.mrf.mxu1 }
  0xb7   :  { %v163_v43 = vadd.f32 %v319_v16, %v162_v41  ;;  %v173_v44 = vadd.f32 %v319_v16, %v172_v42 }
  0xb8   :  { %205 = vst [vmem:[%s442_s3 + $0x50] sm:$0xff] %v181_v39 }
  0xb9   :  { %209 = vst [vmem:[%s442_s3 + $0x70] sm:$0xff] %v191_v40 }
  0xba   :  { %198 = vst [vmem:[%s442_s3 + $0x18] sm:$0xff] %v163_v43 }
  0xbb   :  { %202 = vst [vmem:[%s442_s3 + $0x38] sm:$0xff] %v173_v44 }
  0xbd   :  { %v182_v45 = vpop.f32.mrf.mxu2  ;;  %v192_v46 = vpop.f32.mrf.mxu3 }
  0xbe   :  { %v183_v47 = vadd.f32 %v319_v16, %v182_v45  ;;  %v193_v48 = vadd.f32 %v319_v16, %v192_v46 }
  0xc0   :  { %206 = vst [vmem:[%s442_s3 + $0x58] sm:$0xff] %v183_v47 }
  0xc1   :  { %210 = vst [vmem:[%s442_s3 + $0x78] sm:$0xff] %v193_v48 }

// kernel: mul.165
= control target key start
LH: loop header
LB: loop body
LE: loop exit
PB: predicated region body
PF: predicated region fallthrough
CT: control target
= control target key end

     0   :  { %vm7_vm0 = vcmask 523264   ;;  %s39_s0 = inlined_call_operand.vmem [shape: f32[128], index: 0, kind: input, shape index: {}]   ;;  %s40_s1 = inlined_call_operand.vmem [shape: f32[2,64], index: 1, kind: output, shape index: {}]  }
   0x1   :  { %v4_v0 = vld [vmem:[%s39_s0] sm:$0x1]  ;;  %s22_s0 = smov 64  }
   0x2   :  { %5 = vst [vmem:[#allocation1] sm:$0x1] %v4_v0 }
   0x9   :  { %v9_v1 = vld [vmem:[#allocation1] sm:$0x1]  }
   0xa   :  { %v6_v2 = vld [vmem:[#allocation1] sm:$0x1]   ;;  %10 = vrot.lane.b32.xlu0 %v9_v1, %s22_s0 }
   0xb   :  { %8 = vst.msk [vmem:[#allocation0] sm:$0x1] %vm7_vm0, %v6_v2  }
  0x7c   :  { %v11_v3 = vpop.permute.xlu0 %10  }
  0x7d   :  { %14 = vst.msk [vmem:[#allocation0 + $0x1] sm:$0x1] %vm7_vm0, %v11_v3  }
  0x84   :  { %v17_v4 = vld [vmem:[#allocation0] sm:$0x3] }
  0x85   :  { %20 = vst [vmem:[%s40_s1] sm:$0x3] %v17_v4 }

// kernel: gf_forward.20
= control target key start
LH: loop header
LB: loop body
LE: loop exit
PB: predicated region body
PF: predicated region fallthrough
CT: control target
= control target key end

     0   :  { %s249_s1 = inlined_call_operand.vmem [shape: bf16[128,128], index: 1, kind: input, shape index: {}]   ;;  %s250_s2 = inlined_call_operand.vmem [shape: f32[1,128], index: 2, kind: input, shape index: {}]   ;;  %s251_s0 = inlined_call_operand.vmem [shape: bf16[32,128], index: 0, kind: input, shape index: {}]   ;;  %s252_s3 = inlined_call_operand.vmem [shape: f32[32,128], index: 3, kind: output, shape index: {}]  }
   0x1   :  { %v174_v0 = vld [vmem:[%s249_s1 + $0x38] sm:$0xff]  ;;  %v173_v1 = vld [vmem:[%s249_s1 + $0x30] sm:$0xff]  ;;  %v172_v2 = vld [vmem:[%s249_s1 + $0x28] sm:$0xff] }
   0x2   :  { %98 = vmatpush.bf16.msra.mxu0 %v174_v0  ;;  %175 = vmatpush.bf16.msra.mxu1 %v174_v0  ;;  %v171_v3 = vld [vmem:[%s249_s1 + $0x20] sm:$0xff]  ;;  %v170_v4 = vld [vmem:[%s249_s1 + $0x18] sm:$0xff]  ;;  %v169_v5 = vld [vmem:[%s249_s1 + $0x10] sm:$0xff] }
   0x3   :  { %v168_v6 = vld [vmem:[%s249_s1 + $0x8] sm:$0xff]  ;;  %v167_v7 = vld [vmem:[%s249_s1] sm:$0xff] }
   0x4   :  { %v165_v8 = vld [vmem:[%s251_s0] sm:$0xff]  ;;  %v166_v9 = vld [vmem:[%s251_s0 + $0x8] sm:$0xff] }
   0x5   :  { %v183_v10 = vld [vmem:[%s250_s2] ss:$0 sm:$0xff] }
   0x6   :  { %99 = vmatpush.bf16.msra.mxu0 %v173_v1  ;;  %176 = vmatpush.bf16.msra.mxu1 %v173_v1 }
   0xa   :  { %100 = vmatpush.bf16.msra.mxu0 %v172_v2  ;;  %177 = vmatpush.bf16.msra.mxu1 %v172_v2 }
   0xe   :  { %101 = vmatpush.bf16.msra.mxu0 %v171_v3  ;;  %178 = vmatpush.bf16.msra.mxu1 %v171_v3 }
  0x12   :  { %102 = vmatpush.bf16.msra.mxu0 %v170_v4  ;;  %179 = vmatpush.bf16.msra.mxu1 %v170_v4 }
  0x16   :  { %103 = vmatpush.bf16.msra.mxu0 %v169_v5  ;;  %180 = vmatpush.bf16.msra.mxu1 %v169_v5 }
  0x1a   :  { %104 = vmatpush.bf16.msra.mxu0 %v168_v6  ;;  %181 = vmatpush.bf16.msra.mxu1 %v168_v6 }
  0x1e   :  { %105 = vmatpush.bf16.msra.mxu0 %v167_v7  ;;  %182 = vmatpush.bf16.msra.mxu1 %v167_v7 }
  0x21   :  { %106 = vmatmul.bf16.vlgmr.msra.gmra.mxu0 %v165_v8  ;;  %111 = vmatmul.bf16.vlgmr.msra.gmra.mxu1 %v166_v9 }
  0x9e   :  { %v107_v11 = vpop.f32.mrf.mxu0  ;;  %v112_v12 = vpop.f32.mrf.mxu1 }
  0x9f   :  { %v108_v13 = vadd.f32 %v183_v10, %v107_v11  ;;  %v113_v14 = vadd.f32 %v183_v10, %v112_v12 }
  0xa1   :  { %117 = vst [vmem:[%s252_s3] sm:$0xff] %v108_v13 }
  0xa2   :  { %119 = vst [vmem:[%s252_s3 + $0x10] sm:$0xff] %v113_v14 }
  0xa6   :  { %v109_v15 = vpop.f32.mrf.mxu0  ;;  %v114_v16 = vpop.f32.mrf.mxu1 }
  0xa7   :  { %v110_v17 = vadd.f32 %v183_v10, %v109_v15  ;;  %v115_v18 = vadd.f32 %v183_v10, %v114_v16 }
  0xa9   :  { %118 = vst [vmem:[%s252_s3 + $0x8] sm:$0xff] %v110_v17 }
  0xaa   :  { %120 = vst [vmem:[%s252_s3 + $0x18] sm:$0xff] %v115_v18 }

// kernel: mul.191
= control target key start
LH: loop header
LB: loop body
LE: loop exit
PB: predicated region body
PF: predicated region fallthrough
CT: control target
= control target key end

     0   :  { %vm7_vm0 = vcmask 130048   ;;  %s39_s0 = inlined_call_operand.vmem [shape: f32[32], index: 0, kind: input, shape index: {}]   ;;  %s40_s1 = inlined_call_operand.vmem [shape: f32[2,16], index: 1, kind: output, shape index: {}]  }
   0x1   :  { %v4_v0 = vld [vmem:[%s39_s0] sm:$0x1]  ;;  %s22_s0 = smov 112  }
   0x2   :  { %5 = vst [vmem:[#allocation1] sm:$0x1] %v4_v0 }
   0x9   :  { %v9_v1 = vld [vmem:[#allocation1] sm:$0x1]  }
   0xa   :  { %v6_v2 = vld [vmem:[#allocation1] sm:$0x1]   ;;  %10 = vrot.lane.b32.xlu0 %v9_v1, %s22_s0 }
   0xb   :  { %8 = vst.msk [vmem:[#allocation0] sm:$0x1] %vm7_vm0, %v6_v2  }
  0x7c   :  { %v11_v3 = vpop.permute.xlu0 %10  }
  0x7d   :  { %14 = vst.msk [vmem:[#allocation0 + $0x1] sm:$0x1] %vm7_vm0, %v11_v3  }
  0x84   :  { %v17_v4 = vld [vmem:[#allocation0] sm:$0x3] }
  0x85   :  { %20 = vst [vmem:[%s40_s1] sm:$0x3] %v17_v4 }

// kernel: gf_forward.24
= control target key start
LH: loop header
LB: loop body
LE: loop exit
PB: predicated region body
PF: predicated region fallthrough
CT: control target
= control target key end

     0   :  { %s219_s1 = inlined_call_operand.vmem [shape: bf16[128,128], index: 1, kind: input, shape index: {}]   ;;  %s220_s2 = inlined_call_operand.vmem [shape: f32[1,128], index: 2, kind: input, shape index: {}]   ;;  %s221_s0 = inlined_call_operand.vmem [shape: bf16[8,128], index: 0, kind: input, shape index: {}]   ;;  %s222_s3 = inlined_call_operand.vmem [shape: f32[8,128], index: 3, kind: output, shape index: {}]  }
   0x1   :  { %v160_v0 = vld [vmem:[%s219_s1 + $0x38] sm:$0xff]  ;;  %v159_v1 = vld [vmem:[%s219_s1 + $0x30] sm:$0xff]  ;;  %v158_v2 = vld [vmem:[%s219_s1 + $0x28] sm:$0xff] }
   0x2   :  { %83 = vmatpush.bf16.msra.mxu0 %v160_v0  ;;  %v157_v3 = vld [vmem:[%s219_s1 + $0x20] sm:$0xff]  ;;  %v156_v4 = vld [vmem:[%s219_s1 + $0x18] sm:$0xff]  ;;  %v155_v5 = vld [vmem:[%s219_s1 + $0x10] sm:$0xff] }
   0x3   :  { %v154_v6 = vld [vmem:[%s219_s1 + $0x8] sm:$0xff]  ;;  %v153_v7 = vld [vmem:[%s219_s1] sm:$0xff] }
   0x4   :  { %v14_v8 = vld [vmem:[%s221_s0] sm:$0xf] }
   0x5   :  { %v161_v9 = vld [vmem:[%s220_s2] ss:$0 sm:$0xff] }
   0x6   :  { %84 = vmatpush.bf16.msra.mxu0 %v159_v1 }
   0xa   :  { %85 = vmatpush.bf16.msra.mxu0 %v158_v2 }
   0xe   :  { %86 = vmatpush.bf16.msra.mxu0 %v157_v3 }
  0x12   :  { %87 = vmatpush.bf16.msra.mxu0 %v156_v4 }
  0x16   :  { %88 = vmatpush.bf16.msra.mxu0 %v155_v5 }
  0x1a   :  { %89 = vmatpush.bf16.msra.mxu0 %v154_v6 }
  0x1e   :  { %90 = vmatpush.bf16.msra.mxu0 %v153_v7 }
  0x21   :  { %91 = vmatmul.bf16.vlgmr.msra.gmra.mxu0 %v14_v8 }
  0x9e   :  { %v92_v10 = vpop.f32.mrf.mxu0 }
  0x9f   :  { %v93_v11 = vadd.f32 %v161_v9, %v92_v10 }
  0xa1   :  { %v152_v12 = vmul.f32 -1.442695, %v93_v11 }
  0xa3   :  { %162 = vpow2.f32 %v152_v12 }
  0xa6   :  { %v94_v13 = vpop.f32.mrf.mxu0 }
  0xa9   :  { %v163_v14 = vpop.eup %162 }
  0xaa   :  { %v99_v15 = vadd.f32 1.0, %v163_v14 }
  0xac   :  { %164 = vrcp.f32 %v99_v15  ;;  %v111_v19 = vand.u32 2147483648, %v99_v15  ;;  %v109_v21 = vand.u32 2147483647, %v99_v15  ;;  %vm105_vm1 = vweird.f32 %v99_v15 }
  0xae   :  { %v112_v23 = vor.u32 1.1754944e-38, %v111_v19  ;;  %vm110_vm3 = vcmp.eq.f32.partialorder %v109_v21, 8.507059e+37 }
  0xb2   :  { %v165_v16 = vpop.eup %164 }
  0xb3   :  { %v101_v17 = vmul.f32 %v165_v16, %v99_v15  ;;  %vm106_vm0 = vweird.f32 %v165_v16 }
  0xb4   :  { %vm107_vm2 = vmor %vm105_vm1, %vm106_vm0 }
  0xb5   :  { %v102_v18 = vsub.f32 1.0, %v101_v17 }
  0xb7   :  { %v103_v20 = vmul.f32 %v165_v16, %v102_v18 }
  0xb9   :  { %v104_v22 = vadd.f32 %v165_v16, %v103_v20 }
  0xbb   :  { %v108_v24 = vsel %vm107_vm2, %v165_v16, %v104_v22 }
  0xbc   :  { %v113_v25 = vsel %vm110_vm3, %v112_v23, %v108_v24 }
  0xbd   :  { %115 = vst [vmem:[%s222_s3] sm:$0xff] %v113_v25 }

// kernel: gf_forward.25
= control target key start
LH: loop header
LB: loop body
LE: loop exit
PB: predicated region body
PF: predicated region fallthrough
CT: control target
= control target key end

     0   :  { %s592_s12 = smov 0   ;;  %s594_s13 = smov 0   ;;  %s669_s0 = inlined_call_operand.vmem [shape: bf16[8,128], index: 0, kind: input, shape index: {}]   ;;  %s670_s1 = inlined_call_operand.vmem [shape: bf16[6,128,256], index: 1, kind: input, shape index: {}]   ;;  %s671_s2 = inlined_call_operand.vmem [shape: f32[8,1], index: 2, kind: input, shape index: {}]   ;;  %s672_s3 = inlined_call_operand.vmem [shape: f32[6,8,256], index: 3, kind: output, shape index: {}]  }
   0x1   :  { %s596_s14 = smov 0  }
   0x2 LB: > { %s25_s15 = sadd.s32 1, %s565_s13  ;;  %p432_p0 = scmp.ge.s32.totalorder %s569_s14, 1  ;;  %s569_s14 = sphi %s596_s14, %s13_s14   ;;  %s565_s13 = sphi %s594_s13, %s674_s13   ;;  %s561_s12 = sphi %s592_s12, %s673_s12  }
   0x3   : > { %p27_p1 = scmp.ge.s32.totalorder %s25_s15, 6  ;;  %p158_p2 = scmp.lt.s32.totalorder %s569_s14, 7 }
   0x5   : > { %s676_s15 = smov (%p27_p1, %s25_s15), 0  ;;  %p159_p3 = pnand %p432_p0, %p158_p2 }
   0x6   : > { %p191_p4 = scmp.lt.s32.totalorder (!%p159_p3), %s561_s12, 5 }
   0x7   : > { %162 = sbr.rel (%p159_p3) target bundleno = 184 (0xb8), region = 32 }
   0xc   : > { %s678_s12 = smov (!%p191_p4, %s561_s12), 5  ;;  %v227_v23 = vld [vmem:[%s671_s2] sm:$0xff]  ;;  %v571_v27 = vmov 0  }
   0xd   : > { %s503_s16 = sshll.u32 %s678_s12, 7  ;;  %546 = vset.pattern.permute.xlu0 %v571_v27  ;;  %v210_v50 = vld [vmem:[%s669_s0] sm:$0xf]  ;;  %s504_s24 = sshll.u32 %s678_s12, 4 }
   0xe   : > { %s616_s19 = scalar_lea.vmem %s670_s1, %s503_s16  ;;  %230 = vperm.xlu0 %546, %v227_v23   ;;  %s208_s27 = scalar_lea.vmem %s672_s3, %s504_s24 }
   0xf   : > { %v495_v0 = vld [vmem:[%s616_s19 + $0x70] sm:$0xf]  ;;  %v520_v1 = vld [vmem:[%s616_s19 + $0x74] sm:$0xf0]  ;;  %v519_v2 = vld [vmem:[%s616_s19 + $0x74] sm:$0xf] }
  0x10   : > { %v496_v3 = vor.u32 %v520_v1, %v495_v0  ;;  %v497_v4 = vld [vmem:[%s616_s19 + $0x78] sm:$0xf0]  ;;  %v487_v5 = vld [vmem:[%s616_s19 + $0x60] sm:$0xf]  ;;  %v518_v6 = vld [vmem:[%s616_s19 + $0x64] sm:$0xf0] }
  0x11   : > { %v500_v7 = vor.u32 %v519_v2, %v497_v4  ;;  %v517_v8 = vld [vmem:[%s616_s19 + $0x64] sm:$0xf]  ;;  %v489_v9 = vld [vmem:[%s616_s19 + $0x68] sm:$0xf0]  ;;  %v488_v10 = vor.u32 %v518_v6, %v487_v5  ;;  %v479_v12 = vld [vmem:[%s616_s19 + $0x50] sm:$0xf] }
  0x12   : > { %313 = vmatpush.bf16.msra.mxu0 %v496_v3  ;;  %v492_v11 = vor.u32 %v517_v8, %v489_v9  ;;  %v516_v13 = vld [vmem:[%s616_s19 + $0x54] sm:$0xf0]  ;;  %v515_v14 = vld [vmem:[%s616_s19 + $0x54] sm:$0xf]  ;;  %v481_v15 = vld [vmem:[%s616_s19 + $0x58] sm:$0xf0] }
  0x13   : > { %326 = vmatpush.bf16.msra.mxu1 %v500_v7  ;;  %v480_v16 = vor.u32 %v516_v13, %v479_v12  ;;  %v484_v17 = vor.u32 %v515_v14, %v481_v15  ;;  %v471_v18 = vld [vmem:[%s616_s19 + $0x40] sm:$0xf]  ;;  %v514_v19 = vld [vmem:[%s616_s19 + $0x44] sm:$0xf0]  ;;  %v513_v20 = vld [vmem:[%s616_s19 + $0x44] sm:$0xf] }
  0x14   : > { %v473_v21 = vld [vmem:[%s616_s19 + $0x48] sm:$0xf0]  ;;  %v472_v22 = vor.u32 %v514_v19, %v471_v18  ;;  %v463_v25 = vld [vmem:[%s616_s19 + $0x30] sm:$0xf]  ;;  %v512_v26 = vld [vmem:[%s616_s19 + $0x34] sm:$0xf0] }
  0x15   : > { %v476_v24 = vor.u32 %v513_v20, %v473_v21  ;;  %v511_v28 = vld [vmem:[%s616_s19 + $0x34] sm:$0xf]  ;;  %v465_v29 = vld [vmem:[%s616_s19 + $0x38] sm:$0xf0]  ;;  %v464_v30 = vor.u32 %v512_v26, %v463_v25  ;;  %v455_v32 = vld [vmem:[%s616_s19 + $0x20] sm:$0xf] }
  0x16   : > { %314 = vmatpush.bf16.msra.mxu0 %v488_v10  ;;  %v468_v31 = vor.u32 %v511_v28, %v465_v29  ;;  %v510_v33 = vld [vmem:[%s616_s19 + $0x24] sm:$0xf0]  ;;  %v509_v34 = vld [vmem:[%s616_s19 + $0x24] sm:$0xf]  ;;  %v457_v35 = vld [vmem:[%s616_s19 + $0x28] sm:$0xf0] }
  0x17   : > { %327 = vmatpush.bf16.msra.mxu1 %v492_v11  ;;  %v456_v36 = vor.u32 %v510_v33, %v455_v32  ;;  %v460_v37 = vor.u32 %v509_v34, %v457_v35  ;;  %v447_v38 = vld [vmem:[%s616_s19 + $0x10] sm:$0xf]  ;;  %v508_v39 = vld [vmem:[%s616_s19 + $0x14] sm:$0xf0]  ;;  %v507_v40 = vld [vmem:[%s616_s19 + $0x14] sm:$0xf] }
  0x18   : > { %v449_v41 = vld [vmem:[%s616_s19 + $0x18] sm:$0xf0]  ;;  %v448_v42 = vor.u32 %v508_v39, %v447_v38  ;;  %v439_v44 = vld [vmem:[%s616_s19] sm:$0xf]  ;;  %v506_v45 = vld [vmem:[%s616_s19 + $0x4] sm:$0xf0] }
  0x19   : > { %v452_v43 = vor.u32 %v507_v40, %v449_v41  ;;  %v505_v46 = vld [vmem:[%s616_s19 + $0x4] sm:$0xf]  ;;  %v441_v47 = vld [vmem:[%s616_s19 + $0x8] sm:$0xf0]  ;;  %v440_v48 = vor.u32 %v506_v45, %v439_v44 }
  0x1a   : > { %315 = vmatpush.bf16.msra.mxu0 %v480_v16  ;;  %v444_v49 = vor.u32 %v505_v46, %v441_v47 }
  0x1b   : > { %328 = vmatpush.bf16.msra.mxu1 %v484_v17 }
  0x1e   : > { %316 = vmatpush.bf16.msra.mxu0 %v472_v22 }
  0x1f   : > { %329 = vmatpush.bf16.msra.mxu1 %v476_v24 }
  0x22   : > { %317 = vmatpush.bf16.msra.mxu0 %v464_v30 }
  0x23   : > { %330 = vmatpush.bf16.msra.mxu1 %v468_v31 }
  0x26   : > { %318 = vmatpush.bf16.msra.mxu0 %v456_v36 }
  0x27   : > { %331 = vmatpush.bf16.msra.mxu1 %v460_v37 }
  0x2a   : > { %319 = vmatpush.bf16.msra.mxu0 %v448_v42 }
  0x2b   : > { %332 = vmatpush.bf16.msra.mxu1 %v452_v43 }
  0x2e   : > { %320 = vmatpush.bf16.msra.mxu0 %v440_v48 }
  0x2f   : > { %333 = vmatpush.bf16.msra.mxu1 %v444_v49 }
  0x31   : > { %321 = vmatmul.bf16.vlgmr.msra.gmra.mxu0 %v210_v50 }
  0x32   : > { %334 = vmatmul.bf16.vlgmr.msra.gmra.mxu1 %v210_v50 }
  0x80   : > { %v231_v51 = vpop.permute.xlu0 %230 }
  0xae   : > { %v322_v52 = vpop.f32.mrf.mxu0 }
  0xaf   : > { %v323_v53 = vadd.f32 %v322_v52, %v231_v51  ;;  %v335_v54 = vpop.f32.mrf.mxu1 }
  0xb0   : > { %v336_v55 = vadd.f32 %v335_v54, %v231_v51 }
  0xb1   : > { %339 = vst [vmem:[%s208_s27] sm:$0xff] %v323_v53 }
  0xb2   : > { %340 = vst [vmem:[%s208_s27 + $0x8] sm:$0xff] %v336_v55 }
  0xb6   : > { %v324_v56 = vpop.f32.mrf.mxu0 }
  0xb7   : > { %v337_v57 = vpop.f32.mrf.mxu1 }
  0xb8 PF: > { %s13_s14 = sadd.s32 1, %s569_s14   ;;  %s673_s12 = smov %s565_s13 }
  0xb9   : > { %p10_p5 = scmp.ge.s32.totalorder %s13_s14, 8   ;;  %s674_s13 = smov %s676_s15 }
  0xbb   :  { %12 = sbr.rel (!%p10_p5) target bundleno = 2 (0x2), region = 62 }

// kernel: gf_forward.26
= control target key start
LH: loop header
LB: loop body
LE: loop exit
PB: predicated region body
PF: predicated region fallthrough
CT: control target
= control target key end

     0   :  { %s640_s12 = smov 0   ;;  %s642_s13 = smov 0   ;;  %s717_s0 = inlined_call_operand.vmem [shape: bf16[8,128], index: 0, kind: input, shape index: {}]   ;;  %s718_s1 = inlined_call_operand.vmem [shape: bf16[2,128,256], index: 1, kind: input, shape index: {}]   ;;  %s719_s2 = inlined_call_operand.vmem [shape: f32[8,1], index: 2, kind: input, shape index: {}]   ;;  %s720_s3 = inlined_call_operand.vmem [shape: f32[2,8,256], index: 3, kind: output, shape index: {}]  }
   0x1   :  { %s644_s14 = smov 0  }
   0x2 LB: > { %s25_s15 = sadd.s32 1, %s613_s13  ;;  %p470_p0 = scmp.ge.s32.totalorder %s617_s14, 1  ;;  %s617_s14 = sphi %s644_s14, %s13_s14   ;;  %s613_s13 = sphi %s642_s13, %s722_s13   ;;  %s609_s12 = sphi %s640_s12, %s721_s12  }
   0x3   : > { %p27_p1 = scmp.ge.s32.totalorder %s25_s15, 2  ;;  %p158_p2 = scmp.lt.s32.totalorder %s617_s14, 3 }
   0x5   : > { %s724_s15 = smov (%p27_p1, %s25_s15), 0  ;;  %p159_p3 = pnand %p470_p0, %p158_p2 }
   0x6   : > { %p191_p4 = scmp.lt.s32.totalorder (!%p159_p3), %s609_s12, 1 }
   0x7   : > { %162 = sbr.rel (%p159_p3) target bundleno = 207 (0xcf), region = 32 }
   0xc   : > { %s726_s12 = smov (!%p191_p4, %s609_s12), 1  ;;  %v227_v23 = vld [vmem:[%s719_s2] sm:$0xff]  ;;  %v619_v27 = vmov 0  }
   0xd   : > { %s543_s16 = sshll.u32 %s726_s12, 7  ;;  %586 = vset.pattern.permute.xlu0 %v619_v27  ;;  %v210_v50 = vld [vmem:[%s717_s0] sm:$0xf]  ;;  %s544_s24 = sshll.u32 %s726_s12, 4 }
   0xe   : > { %s664_s19 = scalar_lea.vmem %s718_s1, %s543_s16  ;;  %230 = vperm.xlu0 %586, %v227_v23   ;;  %s208_s27 = scalar_lea.vmem %s720_s3, %s544_s24 }
   0xf   : > { %v533_v0 = vld [vmem:[%s664_s19 + $0x70] sm:$0xf]  ;;  %v560_v1 = vld [vmem:[%s664_s19 + $0x74] sm:$0xf0]  ;;  %v559_v2 = vld [vmem:[%s664_s19 + $0x74] sm:$0xf] }
  0x10   : > { %v534_v3 = vor.u32 %v560_v1, %v533_v0  ;;  %v535_v4 = vld [vmem:[%s664_s19 + $0x78] sm:$0xf0]  ;;  %v525_v5 = vld [vmem:[%s664_s19 + $0x60] sm:$0xf]  ;;  %v558_v6 = vld [vmem:[%s664_s19 + $0x64] sm:$0xf0] }
  0x11   : > { %v538_v7 = vor.u32 %v559_v2, %v535_v4  ;;  %v557_v8 = vld [vmem:[%s664_s19 + $0x64] sm:$0xf]  ;;  %v527_v9 = vld [vmem:[%s664_s19 + $0x68] sm:$0xf0]  ;;  %v526_v10 = vor.u32 %v558_v6, %v525_v5  ;;  %v517_v12 = vld [vmem:[%s664_s19 + $0x50] sm:$0xf] }
  0x12   : > { %313 = vmatpush.bf16.msra.mxu0 %v534_v3  ;;  %v530_v11 = vor.u32 %v557_v8, %v527_v9  ;;  %v556_v13 = vld [vmem:[%s664_s19 + $0x54] sm:$0xf0]  ;;  %v555_v14 = vld [vmem:[%s664_s19 + $0x54] sm:$0xf]  ;;  %v519_v15 = vld [vmem:[%s664_s19 + $0x58] sm:$0xf0] }
  0x13   : > { %326 = vmatpush.bf16.msra.mxu1 %v538_v7  ;;  %v518_v16 = vor.u32 %v556_v13, %v517_v12  ;;  %v522_v17 = vor.u32 %v555_v14, %v519_v15  ;;  %v509_v18 = vld [vmem:[%s664_s19 + $0x40] sm:$0xf]  ;;  %v554_v19 = vld [vmem:[%s664_s19 + $0x44] sm:$0xf0]  ;;  %v553_v20 = vld [vmem:[%s664_s19 + $0x44] sm:$0xf] }
  0x14   : > { %v511_v21 = vld [vmem:[%s664_s19 + $0x48] sm:$0xf0]  ;;  %v510_v22 = vor.u32 %v554_v19, %v509_v18  ;;  %v501_v25 = vld [vmem:[%s664_s19 + $0x30] sm:$0xf]  ;;  %v552_v26 = vld [vmem:[%s664_s19 + $0x34] sm:$0xf0] }
  0x15   : > { %v514_v24 = vor.u32 %v553_v20, %v511_v21  ;;  %v551_v28 = vld [vmem:[%s664_s19 + $0x34] sm:$0xf]  ;;  %v503_v29 = vld [vmem:[%s664_s19 + $0x38] sm:$0xf0]  ;;  %v502_v30 = vor.u32 %v552_v26, %v501_v25  ;;  %v493_v32 = vld [vmem:[%s664_s19 + $0x20] sm:$0xf] }
  0x16   : > { %314 = vmatpush.bf16.msra.mxu0 %v526_v10  ;;  %v506_v31 = vor.u32 %v551_v28, %v503_v29  ;;  %v550_v33 = vld [vmem:[%s664_s19 + $0x24] sm:$0xf0]  ;;  %v549_v34 = vld [vmem:[%s664_s19 + $0x24] sm:$0xf]  ;;  %v495_v35 = vld [vmem:[%s664_s19 + $0x28] sm:$0xf0] }
  0x17   : > { %327 = vmatpush.bf16.msra.mxu1 %v530_v11  ;;  %v494_v36 = vor.u32 %v550_v33, %v493_v32  ;;  %v498_v37 = vor.u32 %v549_v34, %v495_v35  ;;  %v485_v38 = vld [vmem:[%s664_s19 + $0x10] sm:$0xf]  ;;  %v548_v39 = vld [vmem:[%s664_s19 + $0x14] sm:$0xf0]  ;;  %v547_v40 = vld [vmem:[%s664_s19 + $0x14] sm:$0xf] }
  0x18   : > { %v487_v41 = vld [vmem:[%s664_s19 + $0x18] sm:$0xf0]  ;;  %v486_v42 = vor.u32 %v548_v39, %v485_v38  ;;  %v477_v44 = vld [vmem:[%s664_s19] sm:$0xf]  ;;  %v546_v45 = vld [vmem:[%s664_s19 + $0x4] sm:$0xf0] }
  0x19   : > { %v490_v43 = vor.u32 %v547_v40, %v487_v41  ;;  %v545_v46 = vld [vmem:[%s664_s19 + $0x4] sm:$0xf]  ;;  %v479_v47 = vld [vmem:[%s664_s19 + $0x8] sm:$0xf0]  ;;  %v478_v48 = vor.u32 %v546_v45, %v477_v44 }
  0x1a   : > { %315 = vmatpush.bf16.msra.mxu0 %v518_v16  ;;  %v482_v49 = vor.u32 %v545_v46, %v479_v47 }
  0x1b   : > { %328 = vmatpush.bf16.msra.mxu1 %v522_v17 }
  0x1e   : > { %316 = vmatpush.bf16.msra.mxu0 %v510_v22 }
  0x1f   : > { %329 = vmatpush.bf16.msra.mxu1 %v514_v24 }
  0x22   : > { %317 = vmatpush.bf16.msra.mxu0 %v502_v30 }
  0x23   : > { %330 = vmatpush.bf16.msra.mxu1 %v506_v31 }
  0x26   : > { %318 = vmatpush.bf16.msra.mxu0 %v494_v36 }
  0x27   : > { %331 = vmatpush.bf16.msra.mxu1 %v498_v37 }
  0x2a   : > { %319 = vmatpush.bf16.msra.mxu0 %v486_v42 }
  0x2b   : > { %332 = vmatpush.bf16.msra.mxu1 %v490_v43 }
  0x2e   : > { %320 = vmatpush.bf16.msra.mxu0 %v478_v48 }
  0x2f   : > { %333 = vmatpush.bf16.msra.mxu1 %v482_v49 }
  0x31   : > { %321 = vmatmul.bf16.vlgmr.msra.gmra.mxu0 %v210_v50 }
  0x32   : > { %334 = vmatmul.bf16.vlgmr.msra.gmra.mxu1 %v210_v50 }
  0x80   : > { %v231_v51 = vpop.permute.xlu0 %230 }
  0xae   : > { %v322_v52 = vpop.f32.mrf.mxu0 }
  0xaf   : > { %v323_v53 = vadd.f32 %v322_v52, %v231_v51  ;;  %v335_v54 = vpop.f32.mrf.mxu1 }
  0xb0   : > { %v336_v55 = vadd.f32 %v335_v54, %v231_v51 }
  0xb1   : > { %v539_v56 = vmul.f32 -1.442695, %v323_v53 }
  0xb2   : > { %v540_v57 = vmul.f32 -1.442695, %v336_v55 }
  0xb3   : > { %587 = vpow2.f32 %v539_v56 }
  0xb4   : > { %589 = vpow2.f32 %v540_v57 }
  0xb6   : > { %v324_v58 = vpop.f32.mrf.mxu0 }
  0xb7   : > { %v337_v59 = vpop.f32.mrf.mxu1 }
  0xb9   : > { %v588_v60 = vpop.eup %587 }
  0xba   : > { %v590_v61 = vpop.eup %589  ;;  %v345_v62 = vadd.f32 1.0, %v588_v60 }
  0xbb   : > { %v346_v63 = vadd.f32 1.0, %v590_v61 }
  0xbc   : > { %591 = vrcp.f32 %v345_v62  ;;  %v358_v5 = vand.u32 2147483648, %v345_v62  ;;  %v356_v8 = vand.u32 2147483647, %v345_v62  ;;  %vm352_vm2 = vweird.f32 %v345_v62 }
  0xbd   : > { %593 = vrcp.f32 %v346_v63  ;;  %v373_v9 = vand.u32 2147483648, %v346_v63  ;;  %v371_v11 = vand.u32 2147483647, %v346_v63  ;;  %vm367_vm4 = vweird.f32 %v346_v63 }
  0xbe   : > { %v359_v13 = vor.u32 1.1754944e-38, %v358_v5  ;;  %vm357_vm5 = vcmp.eq.f32.partialorder %v356_v8, 8.507059e+37 }
  0xbf   : > { %v374_v16 = vor.u32 1.1754944e-38, %v373_v9  ;;  %vm372_vm7 = vcmp.eq.f32.partialorder %v371_v11, 8.507059e+37 }
  0xc2   : > { %v592_v0 = vpop.eup %591 }
  0xc3   : > { %v594_v1 = vpop.eup %593  ;;  %v348_v2 = vmul.f32 %v592_v0, %v345_v62  ;;  %vm353_vm0 = vweird.f32 %v592_v0 }
  0xc4   : > { %v363_v3 = vmul.f32 %v594_v1, %v346_v63  ;;  %vm368_vm1 = vweird.f32 %v594_v1  ;;  %vm354_vm3 = vmor %vm352_vm2, %vm353_vm0 }
  0xc5   : > { %v349_v4 = vsub.f32 1.0, %v348_v2  ;;  %vm369_vm6 = vmor %vm367_vm4, %vm368_vm1 }
  0xc6   : > { %v364_v6 = vsub.f32 1.0, %v363_v3 }
  0xc7   : > { %v350_v7 = vmul.f32 %v592_v0, %v349_v4 }
  0xc8   : > { %v365_v10 = vmul.f32 %v594_v1, %v364_v6 }
  0xc9   : > { %v351_v12 = vadd.f32 %v592_v0, %v350_v7 }
  0xca   : > { %v366_v14 = vadd.f32 %v594_v1, %v365_v10 }
  0xcb   : > { %v355_v15 = vsel %vm354_vm3, %v592_v0, %v351_v12 }
  0xcc   : > { %v360_v17 = vsel %vm357_vm5, %v359_v13, %v355_v15  ;;  %v370_v18 = vsel %vm369_vm6, %v594_v1, %v366_v14 }
  0xcd   : > { %377 = vst [vmem:[%s208_s27] sm:$0xff] %v360_v17  ;;  %v375_v19 = vsel %vm372_vm7, %v374_v16, %v370_v18 }
  0xce   : > { %378 = vst [vmem:[%s208_s27 + $0x8] sm:$0xff] %v375_v19 }
  0xcf PF: > { %s13_s14 = sadd.s32 1, %s617_s14   ;;  %s721_s12 = smov %s613_s13 }
  0xd0   : > { %p10_p5 = scmp.ge.s32.totalorder %s13_s14, 4   ;;  %s722_s13 = smov %s724_s15 }
  0xd2   :  { %12 = sbr.rel (!%p10_p5) target bundleno = 2 (0x2), region = 62 }

// kernel: gf_forward.27
= control target key start
LH: loop header
LB: loop body
LE: loop exit
PB: predicated region body
PF: predicated region fallthrough
CT: control target
= control target key end

     0   :  { %s651_s12 = smov 0   ;;  %s653_s13 = smov 0   ;;  %s737_s0 = inlined_call_operand.vmem [shape: bf16[24,128], index: 0, kind: input, shape index: {}]   ;;  %s738_s1 = inlined_call_operand.vmem [shape: bf16[2,128,256], index: 1, kind: input, shape index: {}]   ;;  %s739_s2 = inlined_call_operand.vmem [shape: f32[24,1], index: 2, kind: input, shape index: {}]   ;;  %s740_s3 = inlined_call_operand.vmem [shape: f32[2,24,256], index: 3, kind: output, shape index: {}]  }
   0x1   :  { %s655_s14 = smov 0  }
   0x2 LB: > { %s25_s15 = sadd.s32 1, %s624_s13  ;;  %p470_p0 = scmp.ge.s32.totalorder %s628_s14, 1  ;;  %s628_s14 = sphi %s655_s14, %s13_s14   ;;  %s624_s13 = sphi %s653_s13, %s742_s13   ;;  %s620_s12 = sphi %s651_s12, %s741_s12  }
   0x3   : > { %p27_p1 = scmp.ge.s32.totalorder %s25_s15, 2  ;;  %p158_p2 = scmp.lt.s32.totalorder %s628_s14, 3 }
   0x5   : > { %s744_s15 = smov (%p27_p1, %s25_s15), 0  ;;  %p159_p3 = pnand %p470_p0, %p158_p2 }
   0x6   : > { %p191_p4 = scmp.lt.s32.totalorder (!%p159_p3), %s620_s12, 1 }
   0x7   : > { %162 = sbr.rel (%p159_p3) target bundleno = 190 (0xbe), region = 32 }
   0xc   : > { %s746_s12 = smov (!%p191_p4, %s620_s12), 1  ;;  %v229_v23 = vld [vmem:[%s739_s2] sm:$0xff]  ;;  %v231_v24 = vld [vmem:[%s739_s2 + $0x10] sm:$0xff]  ;;  %v630_v30 = vmov 0   ;;  %v230_v38 = vld [vmem:[%s739_s2 + $0x8] sm:$0xff] }
   0xd   : > { %s544_s16 = sshll.u32 %s746_s12, 7  ;;  %604 = vset.pattern.permute.xlu0 %v630_v30  ;;  %605 = vset.pattern.permute.xlu1 %v630_v30  ;;  %v212_v45 = vld [vmem:[%s737_s0 + $0x8] sm:$0xf]  ;;  %v545_v54 = vld [vmem:[%s737_s0] sm:$0xff]  ;;  %s578_s30 = smul.u32 48, %s746_s12 }
   0xe   : > { %s675_s19 = scalar_lea.vmem %s738_s1, %s544_s16  ;;  %234 = vperm.xlu0 %604, %v229_v23   ;;  %244 = vperm.xlu1 %605, %v231_v24   ;;  %v252_v51 = vunpack.c.l.b16 %v212_v45 }
   0xf   : > { %v536_v0 = vld [vmem:[%s675_s19 + $0x70] sm:$0xf]  ;;  %v561_v1 = vld [vmem:[%s675_s19 + $0x74] sm:$0xf0]  ;;  %v560_v2 = vld [vmem:[%s675_s19 + $0x74] sm:$0xf]  ;;  %s208_s6 = scalar_lea.vmem %s740_s3, %s578_s30 }
  0x10   : > { %v537_v3 = vor.u32 %v561_v1, %v536_v0  ;;  %v538_v4 = vld [vmem:[%s675_s19 + $0x78] sm:$0xf0]  ;;  %v528_v5 = vld [vmem:[%s675_s19 + $0x60] sm:$0xf]  ;;  %v559_v6 = vld [vmem:[%s675_s19 + $0x64] sm:$0xf0]  ;;  %v254_v55 = vpack.c.b16 %v252_v51, %v252_v51 }
  0x11   : > { %v541_v7 = vor.u32 %v560_v2, %v538_v4  ;;  %v558_v8 = vld [vmem:[%s675_s19 + $0x64] sm:$0xf]  ;;  %v530_v9 = vld [vmem:[%s675_s19 + $0x68] sm:$0xf0]  ;;  %v529_v10 = vor.u32 %v559_v6, %v528_v5  ;;  %v520_v12 = vld [vmem:[%s675_s19 + $0x50] sm:$0xf] }
  0x12   : > { %337 = vmatpush.bf16.msra.mxu0 %v537_v3  ;;  %562 = vmatpush.bf16.msra.mxu2 %v537_v3  ;;  %v533_v11 = vor.u32 %v558_v8, %v530_v9  ;;  %v557_v13 = vld [vmem:[%s675_s19 + $0x54] sm:$0xf0]  ;;  %v556_v14 = vld [vmem:[%s675_s19 + $0x54] sm:$0xf]  ;;  %v522_v15 = vld [vmem:[%s675_s19 + $0x58] sm:$0xf0] }
  0x13   : > { %355 = vmatpush.bf16.msra.mxu1 %v541_v7  ;;  %570 = vmatpush.bf16.msra.mxu3 %v541_v7  ;;  %v521_v16 = vor.u32 %v557_v13, %v520_v12  ;;  %v525_v17 = vor.u32 %v556_v14, %v522_v15  ;;  %v512_v18 = vld [vmem:[%s675_s19 + $0x40] sm:$0xf]  ;;  %v555_v19 = vld [vmem:[%s675_s19 + $0x44] sm:$0xf0]  ;;  %v554_v20 = vld [vmem:[%s675_s19 + $0x44] sm:$0xf] }
  0x14   : > { %v514_v21 = vld [vmem:[%s675_s19 + $0x48] sm:$0xf0]  ;;  %v513_v22 = vor.u32 %v555_v19, %v512_v18  ;;  %v504_v26 = vld [vmem:[%s675_s19 + $0x30] sm:$0xf]  ;;  %v553_v27 = vld [vmem:[%s675_s19 + $0x34] sm:$0xf0] }
  0x15   : > { %v517_v25 = vor.u32 %v554_v20, %v514_v21  ;;  %v552_v28 = vld [vmem:[%s675_s19 + $0x34] sm:$0xf]  ;;  %v506_v29 = vld [vmem:[%s675_s19 + $0x38] sm:$0xf0]  ;;  %v505_v31 = vor.u32 %v553_v27, %v504_v26  ;;  %v496_v33 = vld [vmem:[%s675_s19 + $0x20] sm:$0xf] }
  0x16   : > { %338 = vmatpush.bf16.msra.mxu0 %v529_v10  ;;  %563 = vmatpush.bf16.msra.mxu2 %v529_v10  ;;  %v509_v32 = vor.u32 %v552_v28, %v506_v29  ;;  %v551_v34 = vld [vmem:[%s675_s19 + $0x24] sm:$0xf0]  ;;  %v550_v35 = vld [vmem:[%s675_s19 + $0x24] sm:$0xf]  ;;  %v498_v36 = vld [vmem:[%s675_s19 + $0x28] sm:$0xf0] }
  0x17   : > { %356 = vmatpush.bf16.msra.mxu1 %v533_v11  ;;  %571 = vmatpush.bf16.msra.mxu3 %v533_v11  ;;  %v497_v37 = vor.u32 %v551_v34, %v496_v33  ;;  %v501_v39 = vor.u32 %v550_v35, %v498_v36  ;;  %v488_v40 = vld [vmem:[%s675_s19 + $0x10] sm:$0xf]  ;;  %v549_v41 = vld [vmem:[%s675_s19 + $0x14] sm:$0xf0]  ;;  %v548_v42 = vld [vmem:[%s675_s19 + $0x14] sm:$0xf] }
  0x18   : > { %v490_v43 = vld [vmem:[%s675_s19 + $0x18] sm:$0xf0]  ;;  %239 = vperm.xlu0 %604, %v230_v38   ;;  %v489_v44 = vor.u32 %v549_v41, %v488_v40  ;;  %v480_v47 = vld [vmem:[%s675_s19] sm:$0xf]  ;;  %v547_v48 = vld [vmem:[%s675_s19 + $0x4] sm:$0xf0] }
  0x19   : > { %v493_v46 = vor.u32 %v548_v42, %v490_v43  ;;  %v546_v49 = vld [vmem:[%s675_s19 + $0x4] sm:$0xf]  ;;  %v482_v50 = vld [vmem:[%s675_s19 + $0x8] sm:$0xf0]  ;;  %v481_v52 = vor.u32 %v547_v48, %v480_v47 }
  0x1a   : > { %339 = vmatpush.bf16.msra.mxu0 %v521_v16  ;;  %564 = vmatpush.bf16.msra.mxu2 %v521_v16  ;;  %v485_v53 = vor.u32 %v546_v49, %v482_v50 }
  0x1b   : > { %357 = vmatpush.bf16.msra.mxu1 %v525_v17  ;;  %572 = vmatpush.bf16.msra.mxu3 %v525_v17 }
  0x1e   : > { %340 = vmatpush.bf16.msra.mxu0 %v513_v22  ;;  %565 = vmatpush.bf16.msra.mxu2 %v513_v22 }
  0x1f   : > { %358 = vmatpush.bf16.msra.mxu1 %v517_v25  ;;  %573 = vmatpush.bf16.msra.mxu3 %v517_v25 }
  0x22   : > { %341 = vmatpush.bf16.msra.mxu0 %v505_v31  ;;  %566 = vmatpush.bf16.msra.mxu2 %v505_v31 }
  0x23   : > { %359 = vmatpush.bf16.msra.mxu1 %v509_v32  ;;  %574 = vmatpush.bf16.msra.mxu3 %v509_v32 }
  0x26   : > { %342 = vmatpush.bf16.msra.mxu0 %v497_v37  ;;  %567 = vmatpush.bf16.msra.mxu2 %v497_v37 }
  0x27   : > { %360 = vmatpush.bf16.msra.mxu1 %v501_v39  ;;  %575 = vmatpush.bf16.msra.mxu3 %v501_v39 }
  0x2a   : > { %343 = vmatpush.bf16.msra.mxu0 %v489_v44  ;;  %568 = vmatpush.bf16.msra.mxu2 %v489_v44 }
  0x2b   : > { %361 = vmatpush.bf16.msra.mxu1 %v493_v46  ;;  %576 = vmatpush.bf16.msra.mxu3 %v493_v46 }
  0x2e   : > { %344 = vmatpush.bf16.msra.mxu0 %v481_v52  ;;  %569 = vmatpush.bf16.msra.mxu2 %v481_v52 }
  0x2f   : > { %362 = vmatpush.bf16.msra.mxu1 %v485_v53  ;;  %577 = vmatpush.bf16.msra.mxu3 %v485_v53 }
  0x31   : > { %345 = vmatmul.bf16.vlgmr.msra.gmra.mxu0 %v545_v54  ;;  %350 = vmatmul.bf16.vlgmr.msra.gmra.mxu2 %v254_v55 }
  0x32   : > { %363 = vmatmul.bf16.vlgmr.msra.gmra.mxu1 %v545_v54  ;;  %368 = vmatmul.bf16.vlgmr.msra.gmra.mxu3 %v254_v55 }
  0x80   : > { %v235_v56 = vpop.permute.xlu0 %234  ;;  %v245_v61 = vpop.permute.xlu1 %244 }
  0x8a   : > { %v240_v1 = vpop.permute.xlu0 %239 }
  0xae   : > { %v346_v57 = vpop.f32.mrf.mxu0 }
  0xaf   : > { %v347_v58 = vadd.f32 %v346_v57, %v235_v56  ;;  %v364_v59 = vpop.f32.mrf.mxu1 }
  0xb0   : > { %v365_v60 = vadd.f32 %v364_v59, %v235_v56 }
  0xb1   : > { %373 = vst [vmem:[%s208_s6] sm:$0xff] %v347_v58 }
  0xb2   : > { %374 = vst [vmem:[%s208_s6 + $0x8] sm:$0xff] %v365_v60 }
  0xb4   : > { %v351_v62 = vpop.f32.mrf.mxu2 }
  0xb5   : > { %v352_v63 = vadd.f32 %v351_v62, %v245_v61  ;;  %v369_v0 = vpop.f32.mrf.mxu3 }
  0xb6   : > { %v370_v2 = vadd.f32 %v369_v0, %v245_v61  ;;  %v348_v3 = vpop.f32.mrf.mxu0 }
  0xb7   : > { %377 = vst [vmem:[%s208_s6 + $0x20] sm:$0xff] %v352_v63  ;;  %v349_v4 = vadd.f32 %v348_v3, %v240_v1  ;;  %v366_v5 = vpop.f32.mrf.mxu1 }
  0xb8   : > { %378 = vst [vmem:[%s208_s6 + $0x28] sm:$0xff] %v370_v2  ;;  %v367_v6 = vadd.f32 %v366_v5, %v240_v1 }
  0xb9   : > { %375 = vst [vmem:[%s208_s6 + $0x10] sm:$0xff] %v349_v4 }
  0xba   : > { %376 = vst [vmem:[%s208_s6 + $0x18] sm:$0xff] %v367_v6 }
  0xbc   : > { %v353_v7 = vpop.f32.mrf.mxu2 }
  0xbd   : > { %v371_v8 = vpop.f32.mrf.mxu3 }
  0xbe PF: > { %s13_s14 = sadd.s32 1, %s628_s14   ;;  %s741_s12 = smov %s624_s13 }
  0xbf   : > { %p10_p5 = scmp.ge.s32.totalorder %s13_s14, 4   ;;  %s742_s13 = smov %s744_s15 }
  0xc1   :  { %12 = sbr.rel (!%p10_p5) target bundleno = 2 (0x2), region = 62 }

</bundles_post_ra>
